<compile_context>
chip_gen: v5e
topology: v5e:2x2
jax: 0.10.0
libtpu: 0.0.40
codegen_flags: <defaults>
</compile_context>

<pallas_src>
import functools
import math

import jax
import jax.numpy as jnp
from jax.experimental import pallas as pl
from jax.experimental.pallas import tpu as pltpu


# --------------------------------------------------------------------------
# Kernel: one (batch b, head h) grid step
# --------------------------------------------------------------------------
def _mha_kernel(xq_ref, xk_ref, xv_ref,
                wq_ref, bq_ref, wk_ref, bk_ref, wv_ref, bv_ref,
                wo_ref, bo_ref,
                o_ref, acc_ref, *, scale):
    """One (b, h) step.

    xq/xk/xv_ref : (S, E)   this batch's rows (resident across the h axis)
    wq/wk/wv_ref : (E, D)   this head's pre-transposed projection columns
    bq/bk/bv_ref : (1, D)   this head's bias slice (f32)
    wo_ref       : (D, E)   this head's rows of Wo^T
    bo_ref       : (1, E)   output bias (f32)
    o_ref        : (S, E)   output block (resident across the h axis)
    acc_ref      : (S, E)   f32 VMEM accumulator for the output projection
    """
    h = pl.program_id(1)
    cdt = wq_ref.dtype  # compute dtype for MXU operands (f32 or bf16)

    @pl.when(h == 0)
    def _():
        acc_ref[...] = jnp.zeros_like(acc_ref)

    # Per-head projections: only this head's D columns -> full projection is
    # computed exactly once over the h grid axis (no redundant MXU work).
    q = jnp.dot(xq_ref[...], wq_ref[...],
                preferred_element_type=jnp.float32) + bq_ref[...]   # (S, D) f32
    k = jnp.dot(xk_ref[...], wk_ref[...],
                preferred_element_type=jnp.float32) + bk_ref[...]   # (S, D) f32
    v = jnp.dot(xv_ref[...], wv_ref[...],
                preferred_element_type=jnp.float32) + bv_ref[...]   # (S, D) f32

    # scores = q @ k^T as a contracting-last-dims dot_general (no transpose op),
    # scaled by 1/sqrt(embed_len) (module quirk: dk = embed_len).
    s = jax.lax.dot_general(
        q.astype(cdt), k.astype(cdt),
        dimension_numbers=(((1,), (1,)), ((), ())),
        preferred_element_type=jnp.float32) * scale                 # (S, S) f32

    # Softmax over the last dim (nn.Softmax(dim=3)); f32, exact normalization.
    m = jnp.max(s, axis=-1, keepdims=True)
    p = jnp.exp(s - m)
    attn = p / jnp.sum(p, axis=-1, keepdims=True)                   # (S, S) f32

    head = jnp.dot(attn.astype(cdt), v.astype(cdt),
                   preferred_element_type=jnp.float32)              # (S, D) f32

    # Fold this head's output straight into the output projection and accumulate:
    #   out = concat_h(head_h) @ Wo^T = sum_h head_h @ Wo^T[h*D:(h+1)*D, :]
    # (no in-kernel concatenation of heads).
    acc_ref[...] += jnp.dot(head.astype(cdt), wo_ref[...],
                            preferred_element_type=jnp.float32)     # (S, E) f32

    @pl.when(h == pl.num_programs(1) - 1)
    def _():
        o_ref[...] = (acc_ref[...] + bo_ref[...]).astype(o_ref.dtype)


# --------------------------------------------------------------------------
# One-time host-side parameter prep (free: done once, outside the hot path)
# --------------------------------------------------------------------------
def prepare_params(params, num_heads, compute_dtype=jnp.float32):
    """PyTorch (out,in) weights -> per-head, pre-transposed layouts.

    Wq/Wk/Wv -> (H, E, D)   (head-sliced columns of W^T)
    biases   -> (H, 1, D)   (kept f32)
    Wo       -> (H, D, E)   (head-sliced rows of Wo^T)
    bo       -> (1, E)      (f32)
    """
    E = params["wq"].shape[0]
    H = num_heads
    D = E // H

    def w_heads(w):
        return jnp.asarray(w).T.reshape(E, H, D).transpose(1, 0, 2).astype(compute_dtype)

    def b_heads(b):
        return jnp.asarray(b).reshape(1, H, D).transpose(1, 0, 2).astype(jnp.float32)

    w_o = jnp.asarray(params["wo"]).T.reshape(H, D, E).astype(compute_dtype)
    b_o = jnp.asarray(params["bo"]).astype(jnp.float32)
    return (w_heads(params["wq"]), b_heads(params["bq"]),
            w_heads(params["wk"]), b_heads(params["bk"]),
            w_heads(params["wv"]), b_heads(params["bv"]),
            w_o, b_o)


# --------------------------------------------------------------------------
# Wrapper: single pallas_call with grid=(B, H)
# --------------------------------------------------------------------------
@functools.partial(jax.jit, static_argnames=("num_heads",))
def multi_head_attention(queries, keys, values,
                         wq, bq, wk, bk, wv, bv, wo, bo, *, num_heads):
    B, S, E = queries.shape
    H = num_heads
    D = E // H
    cdt = wq.dtype
    scale = 1.0 / math.sqrt(E)   # ScaledDotProduct uses dk = embed_len

    # Row-major metadata-only reshapes; cast activations to the compute dtype
    # (bf16 on v6e/v7x halves DMA bytes and MXU passes; f32 accumulation kept).
    xq = queries.reshape(B * S, E).astype(cdt)
    xk = keys.reshape(B * S, E).astype(cdt)
    xv = values.reshape(B * S, E).astype(cdt)

    kernel = functools.partial(_mha_kernel, scale=scale)

    def row_spec():   # (B*S, E) sliced by batch; constant over h -> fetched once per b
        return pl.BlockSpec((S, E), lambda b, h: (b, 0))

    def w_spec():     # (H, E, D) sliced per head; squeezed head dim
        return pl.BlockSpec((None, E, D), lambda b, h: (h, 0, 0))

    def b_spec():     # (H, 1, D) sliced per head
        return pl.BlockSpec((None, 1, D), lambda b, h: (h, 0, 0))

    out2d = pl.pallas_call(
        kernel,
        out_shape=jax.ShapeDtypeStruct((B * S, E), jnp.float32),
        grid=(B, H),
        in_specs=[
            row_spec(), row_spec(), row_spec(),          # xq, xk, xv
            w_spec(), b_spec(),                          # Wq^T head slice, bq
            w_spec(), b_spec(),                          # Wk^T head slice, bk
            w_spec(), b_spec(),                          # Wv^T head slice, bv
            pl.BlockSpec((None, D, E), lambda b, h: (h, 0, 0)),   # Wo^T head rows
            pl.BlockSpec((1, E), lambda b, h: (0, 0)),            # bo
        ],
        out_specs=pl.BlockSpec((S, E), lambda b, h: (b, 0)),      # resident over h
        scratch_shapes=[pltpu.VMEM((S, E), jnp.float32)],         # output accumulator
        compiler_params=pltpu.CompilerParams(
            dimension_semantics=("parallel", "arbitrary")),       # b parallel, h reduction
    )(xq, xk, xv, wq, bq, wk, bk, wv, bv, wo, bo)
    return out2d.reshape(B, S, E)


# --------------------------------------------------------------------------
# Pure-JAX reference (PyTorch-module-equivalent) for verification
# --------------------------------------------------------------------------
def reference_mha(queries, keys, values, params, num_heads):
    B, S, E = queries.shape
    H = num_heads
    D = E // H
    hi = jax.lax.Precision.HIGHEST

    def lin(x, w, b):
        return jnp.einsum("...i,oi->...o", x, w, precision=hi) + b[0]

    q = lin(queries, params["wq"], params["bq"]).reshape(B, S, H, D).transpose(0, 2, 1, 3)
    k = lin(keys, params["wk"], params["bk"]).reshape(B, S, H, D).transpose(0, 2, 1, 3)
    v = lin(values, params["wv"], params["bv"]).reshape(B, S, H, D).transpose(0, 2, 1, 3)
    s = jnp.einsum("bhqd,bhkd->bhqk", q, k, precision=hi) / math.sqrt(E)
    p = jax.nn.softmax(s, axis=-1)
    o = jnp.einsum("bhqk,bhkd->bhqd", p, v, precision=hi)
    o = o.transpose(0, 2, 1, 3).reshape(B, S, E)
    return lin(o, params["wo"], params["bo"])


# --------------------------------------------------------------------------
if __name__ == "__main__":
    # Module-faithful feature dims (embed_len=512, num_heads=8 -> head_length=64),
    # small batch/seq so the script stays tiny and fast.
    EMBED_LEN = 512
    NUM_HEADS = 8
    BATCH = 2
    SEQ = 16

    key = jax.random.PRNGKey(0)
    ks = jax.random.split(key, 11)

    def init_w(k, shape):
        return jax.random.normal(k, shape, dtype=jnp.float32) * 0.05

    params = {
        "wq": init_w(ks[0], (EMBED_LEN, EMBED_LEN)),
        "bq": init_w(ks[1], (1, EMBED_LEN)),
        "wk": init_w(ks[2], (EMBED_LEN, EMBED_LEN)),
        "bk": init_w(ks[3], (1, EMBED_LEN)),
        "wv": init_w(ks[4], (EMBED_LEN, EMBED_LEN)),
        "bv": init_w(ks[5], (1, EMBED_LEN)),
        "wo": init_w(ks[6], (EMBED_LEN, EMBED_LEN)),
        "bo": init_w(ks[7], (1, EMBED_LEN)),
    }

    queries = jax.random.normal(ks[8], (BATCH, SEQ, EMBED_LEN), dtype=jnp.float32)
    keys_in = jax.random.normal(ks[9], (BATCH, SEQ, EMBED_LEN), dtype=jnp.float32)
    values = jax.random.normal(ks[10], (BATCH, SEQ, EMBED_LEN), dtype=jnp.float32)

    ref = reference_mha(queries, keys_in, values, params, NUM_HEADS)

    # f32 operands: tight parity with the PyTorch-equivalent reference.
    prepped_f32 = prepare_params(params, NUM_HEADS, compute_dtype=jnp.float32)
    out = multi_head_attention(queries, keys_in, values, *prepped_f32,
                               num_heads=NUM_HEADS)
    out = jax.block_until_ready(out)
    assert out.shape == (BATCH, SEQ, EMBED_LEN)
    assert jnp.allclose(out, ref, rtol=2e-3, atol=2e-3), (
        "Pallas (f32) output does not match reference")

    # bf16 operands (f32 accumulation, f32 softmax): the v6e/v7x-preferred mode.
    prepped_bf16 = prepare_params(params, NUM_HEADS, compute_dtype=jnp.bfloat16)
    out_bf16 = multi_head_attention(queries, keys_in, values, *prepped_bf16,
                                    num_heads=NUM_HEADS)
    out_bf16 = jax.block_until_ready(out_bf16)
    assert jnp.allclose(out_bf16, ref, rtol=5e-2, atol=5e-2), (
        "Pallas (bf16 operands) output does not match reference")

    print("KERNEL_OK")
</pallas_src>

<mosaic_0001>
module attributes {stable_mosaic.version = 11 : i64} {
  func.func @_mha_kernel(%arg0: i32, %arg1: i32, %arg2: memref<16x512xf32, #tpu.memory_space<vmem>>, %arg3: memref<16x512xf32, #tpu.memory_space<vmem>>, %arg4: memref<16x512xf32, #tpu.memory_space<vmem>>, %arg5: memref<1x512x64xf32, #tpu.memory_space<vmem>>, %arg6: memref<1x1x64xf32, #tpu.memory_space<vmem>>, %arg7: memref<1x512x64xf32, #tpu.memory_space<vmem>>, %arg8: memref<1x1x64xf32, #tpu.memory_space<vmem>>, %arg9: memref<1x512x64xf32, #tpu.memory_space<vmem>>, %arg10: memref<1x1x64xf32, #tpu.memory_space<vmem>>, %arg11: memref<1x64x512xf32, #tpu.memory_space<vmem>>, %arg12: memref<1x512xf32, #tpu.memory_space<vmem>>, %arg13: memref<16x512xf32, #tpu.memory_space<vmem>>, %arg14: memref<16x512xf32, #tpu.memory_space<vmem>>) attributes {dimension_semantics = [#tpu.dimension_semantics<parallel>, #tpu.dimension_semantics<arbitrary>], iteration_bounds = array<i64: 2, 8>, scalar_prefetch = 0 : i64, scratch_operands = 1 : i64, tpu.core_type = #tpu.core_type<tc>, window_params = [{transform_indices = @transform_0, window_bounds = array<i64: 16, 512>}, {transform_indices = @transform_1, window_bounds = array<i64: 16, 512>}, {transform_indices = @transform_2, window_bounds = array<i64: 16, 512>}, {transform_indices = @transform_3, window_bounds = array<i64: 1, 512, 64>}, {transform_indices = @transform_4, window_bounds = array<i64: 1, 1, 64>}, {transform_indices = @transform_5, window_bounds = array<i64: 1, 512, 64>}, {transform_indices = @transform_6, window_bounds = array<i64: 1, 1, 64>}, {transform_indices = @transform_7, window_bounds = array<i64: 1, 512, 64>}, {transform_indices = @transform_8, window_bounds = array<i64: 1, 1, 64>}, {transform_indices = @transform_9, window_bounds = array<i64: 1, 64, 512>}, {pipeline_mode = #tpu.pipeline_mode<synchronous>, transform_indices = @transform_10, window_bounds = array<i64: 1, 512>}, {transform_indices = @transform_11, window_bounds = array<i64: 16, 512>}]} {
    %c0_i32 = arith.constant 0 : i32
    %0 = arith.cmpi eq, %arg1, %c0_i32 : i32
    %1 = arith.extui %0 : i1 to i32
    %c0_i32_0 = arith.constant 0 : i32
    %2 = arith.cmpi ne, %1, %c0_i32_0 : i32
    scf.if %2 {
      %cst_40 = arith.constant 0.000000e+00 : f32
      %49 = vector.broadcast %cst_40 : f32 to vector<16x512xf32>
      %c0_41 = arith.constant 0 : index
      %c0_42 = arith.constant 0 : index
      %50 = vector.load %arg14[%c0_41, %c0_42] : memref<16x512xf32, #tpu.memory_space<vmem>>, vector<16x512xf32>
      tpu.vector_store %arg14[%c0_41, %c0_42], %49 {strides = array<i32>} : memref<16x512xf32, #tpu.memory_space<vmem>>, vector<16x512xf32>,
    } else {
    }
    %c0 = arith.constant 0 : index
    %c0_1 = arith.constant 0 : index
    %3 = vector.load %arg2[%c0, %c0_1] : memref<16x512xf32, #tpu.memory_space<vmem>>, vector<16x512xf32>
    %c0_2 = arith.constant 0 : index
    %c0_3 = arith.constant 0 : index
    %c0_4 = arith.constant 0 : index
    %4 = vector.load %arg5[%c0_2, %c0_3, %c0_4] : memref<1x512x64xf32, #tpu.memory_space<vmem>>, vector<1x512x64xf32>
    %5 = vector.shape_cast %4 : vector<1x512x64xf32> to vector<512x64xf32>
    %cst = arith.constant dense<0.000000e+00> : vector<16x64xf32>
    %6 = tpu.matmul %3, %5, %cst {dimension_numbers = #tpu.dot_dimension_numbers<[1], [0], [0], [1], [0, 0, 1, 1], [], []>} : vector<16x512xf32>, vector<512x64xf32>, vector<16x64xf32> -> vector<16x64xf32>
    %c0_5 = arith.constant 0 : index
    %c0_6 = arith.constant 0 : index
    %c0_7 = arith.constant 0 : index
    %7 = vector.load %arg6[%c0_5, %c0_6, %c0_7] : memref<1x1x64xf32, #tpu.memory_space<vmem>>, vector<1x1x64xf32>
    %8 = vector.shape_cast %7 : vector<1x1x64xf32> to vector<1x64xf32>
    %9 = vector.broadcast %8 : vector<1x64xf32> to vector<16x64xf32>
    %10 = arith.addf %6, %9 : vector<16x64xf32>
    %c0_8 = arith.constant 0 : index
    %c0_9 = arith.constant 0 : index
    %11 = vector.load %arg3[%c0_8, %c0_9] : memref<16x512xf32, #tpu.memory_space<vmem>>, vector<16x512xf32>
    %c0_10 = arith.constant 0 : index
    %c0_11 = arith.constant 0 : index
    %c0_12 = arith.constant 0 : index
    %12 = vector.load %arg7[%c0_10, %c0_11, %c0_12] : memref<1x512x64xf32, #tpu.memory_space<vmem>>, vector<1x512x64xf32>
    %13 = vector.shape_cast %12 : vector<1x512x64xf32> to vector<512x64xf32>
    %cst_13 = arith.constant dense<0.000000e+00> : vector<16x64xf32>
    %14 = tpu.matmul %11, %13, %cst_13 {dimension_numbers = #tpu.dot_dimension_numbers<[1], [0], [0], [1], [0, 0, 1, 1], [], []>} : vector<16x512xf32>, vector<512x64xf32>, vector<16x64xf32> -> vector<16x64xf32>
    %c0_14 = arith.constant 0 : index
    %c0_15 = arith.constant 0 : index
    %c0_16 = arith.constant 0 : index
    %15 = vector.load %arg8[%c0_14, %c0_15, %c0_16] : memref<1x1x64xf32, #tpu.memory_space<vmem>>, vector<1x1x64xf32>
    %16 = vector.shape_cast %15 : vector<1x1x64xf32> to vector<1x64xf32>
    %17 = vector.broadcast %16 : vector<1x64xf32> to vector<16x64xf32>
    %18 = arith.addf %14, %17 : vector<16x64xf32>
    %c0_17 = arith.constant 0 : index
    %c0_18 = arith.constant 0 : index
    %19 = vector.load %arg4[%c0_17, %c0_18] : memref<16x512xf32, #tpu.memory_space<vmem>>, vector<16x512xf32>
    %c0_19 = arith.constant 0 : index
    %c0_20 = arith.constant 0 : index
    %c0_21 = arith.constant 0 : index
    %20 = vector.load %arg9[%c0_19, %c0_20, %c0_21] : memref<1x512x64xf32, #tpu.memory_space<vmem>>, vector<1x512x64xf32>
    %21 = vector.shape_cast %20 : vector<1x512x64xf32> to vector<512x64xf32>
    %cst_22 = arith.constant dense<0.000000e+00> : vector<16x64xf32>
    %22 = tpu.matmul %19, %21, %cst_22 {dimension_numbers = #tpu.dot_dimension_numbers<[1], [0], [0], [1], [0, 0, 1, 1], [], []>} : vector<16x512xf32>, vector<512x64xf32>, vector<16x64xf32> -> vector<16x64xf32>
    %c0_23 = arith.constant 0 : index
    %c0_24 = arith.constant 0 : index
    %c0_25 = arith.constant 0 : index
    %23 = vector.load %arg10[%c0_23, %c0_24, %c0_25] : memref<1x1x64xf32, #tpu.memory_space<vmem>>, vector<1x1x64xf32>
    %24 = vector.shape_cast %23 : vector<1x1x64xf32> to vector<1x64xf32>
    %25 = vector.broadcast %24 : vector<1x64xf32> to vector<16x64xf32>
    %26 = arith.addf %22, %25 : vector<16x64xf32>
    %cst_26 = arith.constant dense<0.000000e+00> : vector<16x16xf32>
    %27 = tpu.matmul %10, %18, %cst_26 {dimension_numbers = #tpu.dot_dimension_numbers<[1], [1], [0], [0], [0, 0, 1, 0], [], []>} : vector<16x64xf32>, vector<16x64xf32>, vector<16x16xf32> -> vector<16x16xf32>
    %cst_27 = arith.constant 0.0441941731 : f32
    %28 = vector.broadcast %cst_27 : f32 to vector<16x16xf32>
    %29 = arith.mulf %27, %28 : vector<16x16xf32>
    %cst_28 = arith.constant dense<0xFF800000> : vector<16xf32>
    %30 = vector.multi_reduction <maximumf>, %29, %cst_28 [1] : vector<16x16xf32> to vector<16xf32>
    %31 = vector.shape_cast %30 : vector<16xf32> to vector<16x1xf32>
    %32 = vector.broadcast %31 : vector<16x1xf32> to vector<16x16xf32>
    %33 = arith.subf %29, %32 : vector<16x16xf32>
    %34 = math.exp %33 : vector<16x16xf32>
    %cst_29 = arith.constant dense<0.000000e+00> : vector<16xf32>
    %35 = vector.multi_reduction <add>, %34, %cst_29 [1] : vector<16x16xf32> to vector<16xf32>
    %36 = vector.shape_cast %35 : vector<16xf32> to vector<16x1xf32>
    %37 = vector.broadcast %36 : vector<16x1xf32> to vector<16x16xf32>
    %38 = arith.divf %34, %37 : vector<16x16xf32>
    %cst_30 = arith.constant dense<0.000000e+00> : vector<16x64xf32>
    %39 = tpu.matmul %38, %26, %cst_30 {dimension_numbers = #tpu.dot_dimension_numbers<[1], [0], [0], [1], [0, 0, 1, 1], [], []>} : vector<16x16xf32>, vector<16x64xf32>, vector<16x64xf32> -> vector<16x64xf32>
    %c0_31 = arith.constant 0 : index
    %c0_32 = arith.constant 0 : index
    %40 = vector.load %arg14[%c0_31, %c0_32] : memref<16x512xf32, #tpu.memory_space<vmem>>, vector<16x512xf32>
    %c0_33 = arith.constant 0 : index
    %c0_34 = arith.constant 0 : index
    %c0_35 = arith.constant 0 : index
    %41 = vector.load %arg11[%c0_33, %c0_34, %c0_35] : memref<1x64x512xf32, #tpu.memory_space<vmem>>, vector<1x64x512xf32>
    %42 = vector.shape_cast %41 : vector<1x64x512xf32> to vector<64x512xf32>
    %cst_36 = arith.constant dense<0.000000e+00> : vector<16x512xf32>
    %43 = tpu.matmul %39, %42, %cst_36 {dimension_numbers = #tpu.dot_dimension_numbers<[1], [0], [0], [1], [0, 0, 1, 1], [], []>} : vector<16x64xf32>, vector<64x512xf32>, vector<16x512xf32> -> vector<16x512xf32>
    %44 = arith.addf %40, %43 : vector<16x512xf32>
    %c0_37 = arith.constant 0 : index
    %c0_38 = arith.constant 0 : index
    %45 = vector.load %arg14[%c0_37, %c0_38] : memref<16x512xf32, #tpu.memory_space<vmem>>, vector<16x512xf32>
    tpu.vector_store %arg14[%c0_37, %c0_38], %44 {strides = array<i32>} : memref<16x512xf32, #tpu.memory_space<vmem>>, vector<16x512xf32>,
    %c7_i32 = arith.constant 7 : i32
    %46 = arith.cmpi eq, %arg1, %c7_i32 : i32
    %47 = arith.extui %46 : i1 to i32
    %c0_i32_39 = arith.constant 0 : i32
    %48 = arith.cmpi ne, %47, %c0_i32_39 : i32
    scf.if %48 {
      %c0_40 = arith.constant 0 : index
      %c0_41 = arith.constant 0 : index
      %49 = vector.load %arg14[%c0_40, %c0_41] : memref<16x512xf32, #tpu.memory_space<vmem>>, vector<16x512xf32>
      %c0_42 = arith.constant 0 : index
      %c0_43 = arith.constant 0 : index
      %50 = vector.load %arg12[%c0_42, %c0_43] : memref<1x512xf32, #tpu.memory_space<vmem>>, vector<1x512xf32>
      %51 = vector.broadcast %50 : vector<1x512xf32> to vector<16x512xf32>
      %52 = arith.addf %49, %51 : vector<16x512xf32>
      %c0_44 = arith.constant 0 : index
      %c0_45 = arith.constant 0 : index
      %53 = vector.load %arg13[%c0_44, %c0_45] : memref<16x512xf32, #tpu.memory_space<vmem>>, vector<16x512xf32>
      tpu.vector_store %arg13[%c0_44, %c0_45], %52 {strides = array<i32>} : memref<16x512xf32, #tpu.memory_space<vmem>>, vector<16x512xf32>,
    } else {
    }
    return
  }
  func.func @transform_0(%arg0: i32, %arg1: i32) -> (i32, i32) {
    %c0_i32 = arith.constant 0 : i32
    %c0_i32_0 = arith.constant 0 : i32
    return %arg0, %c0_i32 : i32, i32
  }
  func.func @transform_1(%arg0: i32, %arg1: i32) -> (i32, i32) {
    %c0_i32 = arith.constant 0 : i32
    %c0_i32_0 = arith.constant 0 : i32
    return %arg0, %c0_i32 : i32, i32
  }
  func.func @transform_2(%arg0: i32, %arg1: i32) -> (i32, i32) {
    %c0_i32 = arith.constant 0 : i32
    %c0_i32_0 = arith.constant 0 : i32
    return %arg0, %c0_i32 : i32, i32
  }
  func.func @transform_3(%arg0: i32, %arg1: i32) -> (i32, i32, i32) {
    %c0_i32 = arith.constant 0 : i32
    %c0_i32_0 = arith.constant 0 : i32
    %c0_i32_1 = arith.constant 0 : i32
    return %arg1, %c0_i32, %c0_i32_0 : i32, i32, i32
  }
  func.func @transform_4(%arg0: i32, %arg1: i32) -> (i32, i32, i32) {
    %c0_i32 = arith.constant 0 : i32
    %c0_i32_0 = arith.constant 0 : i32
    %c0_i32_1 = arith.constant 0 : i32
    return %arg1, %c0_i32, %c0_i32_0 : i32, i32, i32
  }
  func.func @transform_5(%arg0: i32, %arg1: i32) -> (i32, i32, i32) {
    %c0_i32 = arith.constant 0 : i32
    %c0_i32_0 = arith.constant 0 : i32
    %c0_i32_1 = arith.constant 0 : i32
    return %arg1, %c0_i32, %c0_i32_0 : i32, i32, i32
  }
  func.func @transform_6(%arg0: i32, %arg1: i32) -> (i32, i32, i32) {
    %c0_i32 = arith.constant 0 : i32
    %c0_i32_0 = arith.constant 0 : i32
    %c0_i32_1 = arith.constant 0 : i32
    return %arg1, %c0_i32, %c0_i32_0 : i32, i32, i32
  }
  func.func @transform_7(%arg0: i32, %arg1: i32) -> (i32, i32, i32) {
    %c0_i32 = arith.constant 0 : i32
    %c0_i32_0 = arith.constant 0 : i32
    %c0_i32_1 = arith.constant 0 : i32
    return %arg1, %c0_i32, %c0_i32_0 : i32, i32, i32
  }
  func.func @transform_8(%arg0: i32, %arg1: i32) -> (i32, i32, i32) {
    %c0_i32 = arith.constant 0 : i32
    %c0_i32_0 = arith.constant 0 : i32
    %c0_i32_1 = arith.constant 0 : i32
    return %arg1, %c0_i32, %c0_i32_0 : i32, i32, i32
  }
  func.func @transform_9(%arg0: i32, %arg1: i32) -> (i32, i32, i32) {
    %c0_i32 = arith.constant 0 : i32
    %c0_i32_0 = arith.constant 0 : i32
    %c0_i32_1 = arith.constant 0 : i32
    return %arg1, %c0_i32, %c0_i32_0 : i32, i32, i32
  }
  func.func @transform_10(%arg0: i32, %arg1: i32) -> (i32, i32) {
    %c0_i32 = arith.constant 0 : i32
    %c0_i32_0 = arith.constant 0 : i32
    %c0_i32_1 = arith.constant 0 : i32
    return %c0_i32, %c0_i32_0 : i32, i32
  }
  func.func @transform_11(%arg0: i32, %arg1: i32) -> (i32, i32) {
    %c0_i32 = arith.constant 0 : i32
    %c0_i32_0 = arith.constant 0 : i32
    return %arg0, %c0_i32 : i32, i32
  }
}

</mosaic_0001>

<bundles_post_ra>
// kernel: multi_head_attention.1
= control target key start
LH: loop header
LB: loop body
LE: loop exit
PB: predicated region body
PF: predicated region fallthrough
CT: control target
= control target key end

     0   :  { %s2425_s0 = inlined_call_operand.vmem [shape: f32[32,512], index: 0, kind: input, shape index: {}]   ;;  %s2426_s1 = inlined_call_operand.vmem [shape: f32[32,512], index: 1, kind: input, shape index: {}]   ;;  %s2427_s2 = inlined_call_operand.vmem [shape: f32[32,512], index: 2, kind: input, shape index: {}]   ;;  %s2428_s3 = inlined_call_operand.vmem [shape: f32[8,512,64], index: 3, kind: input, shape index: {}]   ;;  %s2429_s4 = inlined_call_operand.vmem [shape: f32[8,1,64], index: 4, kind: input, shape index: {}]   ;;  %s2430_s5 = inlined_call_operand.vmem [shape: f32[8,512,64], index: 5, kind: input, shape index: {}]   ;;  %s2431_s6 = inlined_call_operand.vmem [shape: f32[8,1,64], index: 6, kind: input, shape index: {}]   ;;  %s2432_s7 = inlined_call_operand.vmem [shape: f32[8,512,64], index: 7, kind: input, shape index: {}]   ;;  %s2433_s8 = inlined_call_operand.vmem [shape: f32[8,1,64], index: 8, kind: input, shape index: {}]   ;;  %s2434_s9 = inlined_call_operand.vmem [shape: f32[8,64,512], index: 9, kind: input, shape index: {}]   ;;  %s2435_s10 = inlined_call_operand.vmem [shape: f32[1,512], index: 10, kind: input, shape index: {}]   ;;  %s2436_s11 = inlined_call_operand.hbm [shape: f32[32,512], index: 11, kind: output, shape index: {}]  }
   0x1   :  { %2450 = sst [smem:[#allocation17_spill]] %s2425_s0 }
   0x2   :  { %2451 = sst [smem:[#allocation18_spill]] %s2426_s1 }
   0x3   :  { %2452 = sst [smem:[#allocation19_spill]] %s2427_s2 }
   0x4   :  { %2453 = sst [smem:[#allocation20_spill]] %s2428_s3 }
   0x5   :  { %2454 = sst [smem:[#allocation21_spill]] %s2436_s11 }
   0x6   :  { %16 = vsyncpa [#allocation4], 0 }
   0x7   :  { %18 = vsyncpa [#allocation4 + $0x1], 0  ;;  %s1902_s17 = smov 0   ;;  %s1904_s18 = smov 0  }
   0x8   :  { %s1906_s19 = smov 0   ;;  %s1908_s20 = smov 0  }
   0x9   :  { %s1910_s21 = smov 0   ;;  %s1912_s22 = smov 0  }
   0xa   :  { %s1914_s23 = smov 0   ;;  %s1916_s24 = smov 0  }
   0xb LB: > { %2455 = sst [smem:[#allocation6_spill]] %s1809_s17  ;;  %s1588_s25 = sadd.s32 4294967295, %s1837_s24   ;;  %s1837_s24 = sphi %s1916_s24, %s24_s24   ;;  %s1833_s23 = sphi %s1914_s23, %s2487_s23   ;;  %s1829_s22 = sphi %s1912_s22, %s2486_s22   ;;  %s1825_s21 = sphi %s1910_s21, %s2485_s21   ;;  %s1821_s20 = sphi %s1908_s20, %s2484_s20   ;;  %s1817_s19 = sphi %s1906_s19, %s2483_s19   ;;  %s1813_s18 = sphi %s1904_s18, %s2482_s18   ;;  %s1809_s17 = sphi %s1902_s17, %s2481_s17  }
   0xc   : > { %2456 = sst [smem:[#allocation7_spill]] %s1813_s18  ;;  %s1589_s26 = sadd.s32 4294967294, %s1837_s24  }
   0xd   : > { %2457 = sst [smem:[#allocation8_spill]] %s1817_s19  ;;  %s33_s27 = sadd.s32 1, %s1829_s22 }
   0xe   : > { %2458 = sst [smem:[#allocation9_spill]] %s1829_s22  ;;  %p34_p0 = scmp.ge.s32.totalorder %s33_s27, 8 }
   0xf   : > { %2459 = sst [smem:[#allocation10_spill]] %s1833_s23  ;;  %s36_s28 = sadd.s32 1, %s1833_s23 }
  0x10   : > { %2460 = sst [smem:[#allocation11_spill]] %s1837_s24  ;;  %p334_p1 = scmp.ne.s32.totalorder %s1817_s19, %s1813_s18 }
  0x11   : > { %p335_p2 = scmp.eq.s32.totalorder %s1588_s25, 15  ;;  %s2489_s27 = smov (%p34_p0, %s33_s27), 0 }
  0x12   : > { %2461 = sst [smem:[#allocation12_spill]] %s2489_s27  ;;  %s2491_s28 = smov (!%p34_p0, %s36_s28), %s1833_s23 }
  0x13   : > { %p1951_p3 = por %p335_p2, %p334_p1  ;;  %p340_p4 = scmp.ne.s32.totalorder %s1813_s18, %s1809_s17 }
  0x14   : > { %p38_p5 = scmp.ge.s32.totalorder %s2491_s28, 2  ;;  %p341_p6 = scmp.eq.s32.totalorder %s1589_s26, 15 }
  0x15   : > { %s2462_s29 = scalar_select %p1951_p3, 1, 0 }
  0x16   : > { %p1592_p7 = scmp.ge.s32.totalorder %s1837_s24, 1  ;;  %p442_p8 = scmp.lt.s32.totalorder %s1837_s24, 17 }
  0x17   : > { %2463 = sst [smem:[#allocation13_spill]] %s2462_s29  ;;  %s2493_s28 = smov (%p38_p5, %s2491_s28), 0 }
  0x18   : > { %2464 = sst [smem:[#allocation14_spill]] %s2493_s28  ;;  %p1961_p9 = por %p341_p6, %p340_p4 }
  0x19   : > { %p443_p10 = pnand %p1592_p7, %p442_p8  ;;  %s321_s12 = ssub.s32 %s1833_s23, %s2493_s28 }
  0x1a   : > { %s2465_s30 = scalar_select %p1961_p9, 1, 0 }
  0x1b   : > { %s324_s13 = sadd.s32 1, %s1817_s19  ;;  %p322_p11 = scmp.eq.s32.totalorder %s321_s12, 0 }
  0x1c   : > { %2466 = sst [smem:[#allocation15_spill]] %s2465_s30  ;;  %446 = sbr.rel (%p443_p10) target bundleno = 982 (0x3d6), region = 64 }
  0x1d   : > { %s1969_s14 = scalar_select %p322_p11, %s1817_s19, %s324_s13  }
  0x1e   : > { %s2440_s15 = sand.u32 (!%p443_p10), 1, %s1813_s18   ;;  %s1594_s16 = sshll.u32 (!%p443_p10), %s1825_s21, 1 }
  0x1f   : > { %2467 = sst [smem:[#allocation16_spill]] %s1969_s14  ;;  %s1593_s25 = sshll.u32 (!%p443_p10), %s2440_s15, 6 }
  0x20   : > { %p525_p12 = scmp.lt.s32.totalorder (!%p443_p10), %s1594_s16, 3  ;;  %p545_p13 = scmp.lt.s32.totalorder (!%p443_p10), %s1821_s20, 7 }
  0x21   : > { %s2468_s0 = sld [smem:[#allocation17_spill]]  ;;  %s2028_s18 = scalar_lea.vmem [#allocation3], %s1593_s25 }
  0x22   : > { %s2495_s16 = smov (!%p525_p12, %s1594_s16), 3  ;;  %s2469_s1 = sld [smem:[#allocation18_spill]] }
  0x23   : > { %s1977_s26 = scalar_select %p545_p13, %s1821_s20, 7 }
  0x24   : > { %s1633_s12 = sshll.u32 %s2495_s16, 5  ;;  %s2470_s2 = sld [smem:[#allocation19_spill]] }
  0x25   : > { %s1636_s17 = sshll.u32 %s1977_s26, 9  ;;  %s2471_s3 = sld [smem:[#allocation20_spill]] }
  0x26   : > { %s2007_s22 = scalar_lea.vmem %s2430_s5, %s1636_s17  ;;  %s560_s19 = scalar_lea.vmem %s2431_s6, %s1977_s26 }
  0x27   : > { %s1982_s27 = scalar_lea.vmem %s2468_s0, %s1633_s12  ;;  %s1639_s29 = sshll.u32 %s1977_s26, 8 }
  0x28   : > { %s1987_s15 = scalar_lea.vmem %s2469_s1, %s1633_s12  ;;  %s2026_s0 = scalar_lea.vmem %s2434_s9, %s1639_s29 }
  0x29   : > { %p1611_p0 = scmp.ne.s32.totalorder %s1821_s20, 0 }
  0x2a   : > { %s1992_s30 = scalar_lea.vmem %s2470_s2, %s1633_s12  ;;  %s2016_s2 = scalar_lea.vmem %s2432_s7, %s1636_s17 }
  0x2b   : > { %s1998_s16 = scalar_lea.vmem %s2471_s3, %s1636_s17  ;;  %s568_s3 = scalar_lea.vmem %s2433_s8, %s1977_s26 }
  0x2c   : > { %578 = sbr.rel (%p1611_p0) target bundleno = 58 (0x3a), region = 68 }
  0x31   : > { %v1839_v0 = vmov 0.0  }
  0x32   : > { %579 = vst [vmem:[#allocation2 + $0x30] sm:$0xff] %v1839_v0 }
  0x33   : > { %580 = vst [vmem:[#allocation2] sm:$0xff] %v1839_v0 }
  0x34   : > { %581 = vst [vmem:[#allocation2 + $0x18] sm:$0xff] %v1839_v0 }
  0x35   : > { %582 = vst [vmem:[#allocation2 + $0x10] sm:$0xff] %v1839_v0 }
  0x36   : > { %583 = vst [vmem:[#allocation2 + $0x8] sm:$0xff] %v1839_v0 }
  0x37   : > { %584 = vst [vmem:[#allocation2 + $0x20] sm:$0xff] %v1839_v0 }
  0x38   : > { %585 = vst [vmem:[#allocation2 + $0x28] sm:$0xff] %v1839_v0 }
  0x39   : > { %586 = vst [vmem:[#allocation2 + $0x38] sm:$0xff] %v1839_v0 }
  0x3a PF: > { %v642_v1 = vld [vmem:[%s1998_s16 + $0x178] sm:$0xff]  ;;  %v641_v3 = vld [vmem:[%s1998_s16 + $0x170] sm:$0xff]  ;;  %v640_v7 = vld [vmem:[%s1998_s16 + $0x168] sm:$0xff]  ;;  %vm1091_vm0 = vcmask 523264   ;;  %vm1129_vm1 = vcmask 130048   ;;  %p1626_p1 = scmp.ne.s32.totalorder %s1821_s20, 7 }
  0x3b   : > { %v610_v2 = vld [vmem:[%s1998_s16 + $0x78] sm:$0xff]  ;;  %709 = vmatpush.msra.mxu2 %v642_v1  ;;  %v609_v5 = vld [vmem:[%s1998_s16 + $0x70] sm:$0xff]  ;;  %v608_v9 = vld [vmem:[%s1998_s16 + $0x68] sm:$0xff] }
  0x3c   : > { %663 = vmatpush.msra.mxu0 %v610_v2  ;;  %v658_v4 = vld [vmem:[%s1998_s16 + $0x1f8] sm:$0xff]  ;;  %v657_v8 = vld [vmem:[%s1998_s16 + $0x1f0] sm:$0xff]  ;;  %v656_v11 = vld [vmem:[%s1998_s16 + $0x1e8] sm:$0xff] }
  0x3d   : > { %v626_v6 = vld [vmem:[%s1998_s16 + $0xf8] sm:$0xff]  ;;  %732 = vmatpush.msra.mxu3 %v658_v4  ;;  %710 = vmatpush.msra.mxu2 %v641_v3  ;;  %v625_v10 = vld [vmem:[%s1998_s16 + $0xf0] sm:$0xff]  ;;  %v639_v12 = vld [vmem:[%s1998_s16 + $0x160] sm:$0xff] }
  0x3e   : > { %686 = vmatpush.msra.mxu1 %v626_v6  ;;  %664 = vmatpush.msra.mxu0 %v609_v5  ;;  %v607_v13 = vld [vmem:[%s1998_s16 + $0x60] sm:$0xff]  ;;  %v624_v14 = vld [vmem:[%s1998_s16 + $0xe8] sm:$0xff]  ;;  %v638_v17 = vld [vmem:[%s1998_s16 + $0x158] sm:$0xff] }
  0x3f   : > { %733 = vmatpush.msra.mxu3 %v657_v8  ;;  %711 = vmatpush.msra.mxu2 %v640_v7  ;;  %v655_v15 = vld [vmem:[%s1998_s16 + $0x1e0] sm:$0xff]  ;;  %v606_v18 = vld [vmem:[%s1998_s16 + $0x58] sm:$0xff]  ;;  %v637_v21 = vld [vmem:[%s1998_s16 + $0x150] sm:$0xff] }
  0x40   : > { %687 = vmatpush.msra.mxu1 %v625_v10  ;;  %665 = vmatpush.msra.mxu0 %v608_v9  ;;  %v623_v16 = vld [vmem:[%s1998_s16 + $0xe0] sm:$0xff]  ;;  %v654_v19 = vld [vmem:[%s1998_s16 + $0x1d8] sm:$0xff]  ;;  %v605_v22 = vld [vmem:[%s1998_s16 + $0x50] sm:$0xff] }
  0x41   : > { %734 = vmatpush.msra.mxu3 %v656_v11  ;;  %712 = vmatpush.msra.mxu2 %v639_v12  ;;  %v622_v20 = vld [vmem:[%s1998_s16 + $0xd8] sm:$0xff]  ;;  %v653_v23 = vld [vmem:[%s1998_s16 + $0x1d0] sm:$0xff]  ;;  %v636_v25 = vld [vmem:[%s1998_s16 + $0x148] sm:$0xff] }
  0x42   : > { %688 = vmatpush.msra.mxu1 %v624_v14  ;;  %666 = vmatpush.msra.mxu0 %v607_v13  ;;  %v621_v24 = vld [vmem:[%s1998_s16 + $0xd0] sm:$0xff]  ;;  %v604_v26 = vld [vmem:[%s1998_s16 + $0x48] sm:$0xff]  ;;  %v635_v29 = vld [vmem:[%s1998_s16 + $0x140] sm:$0xff] }
  0x43   : > { %735 = vmatpush.msra.mxu3 %v655_v15  ;;  %713 = vmatpush.msra.mxu2 %v638_v17  ;;  %v652_v27 = vld [vmem:[%s1998_s16 + $0x1c8] sm:$0xff]  ;;  %v603_v30 = vld [vmem:[%s1998_s16 + $0x40] sm:$0xff]  ;;  %v634_v33 = vld [vmem:[%s1998_s16 + $0x138] sm:$0xff] }
  0x44   : > { %689 = vmatpush.msra.mxu1 %v623_v16  ;;  %667 = vmatpush.msra.mxu0 %v606_v18  ;;  %v620_v28 = vld [vmem:[%s1998_s16 + $0xc8] sm:$0xff]  ;;  %v651_v31 = vld [vmem:[%s1998_s16 + $0x1c0] sm:$0xff]  ;;  %v602_v34 = vld [vmem:[%s1998_s16 + $0x38] sm:$0xff] }
  0x45   : > { %736 = vmatpush.msra.mxu3 %v654_v19  ;;  %714 = vmatpush.msra.mxu2 %v637_v21  ;;  %v619_v32 = vld [vmem:[%s1998_s16 + $0xc0] sm:$0xff]  ;;  %v650_v35 = vld [vmem:[%s1998_s16 + $0x1b8] sm:$0xff]  ;;  %v633_v37 = vld [vmem:[%s1998_s16 + $0x130] sm:$0xff] }
  0x46   : > { %690 = vmatpush.msra.mxu1 %v622_v20  ;;  %668 = vmatpush.msra.mxu0 %v605_v22  ;;  %v618_v36 = vld [vmem:[%s1998_s16 + $0xb8] sm:$0xff]  ;;  %v601_v38 = vld [vmem:[%s1998_s16 + $0x30] sm:$0xff]  ;;  %v632_v41 = vld [vmem:[%s1998_s16 + $0x128] sm:$0xff] }
  0x47   : > { %737 = vmatpush.msra.mxu3 %v653_v23  ;;  %715 = vmatpush.msra.mxu2 %v636_v25  ;;  %v649_v39 = vld [vmem:[%s1998_s16 + $0x1b0] sm:$0xff]  ;;  %v600_v42 = vld [vmem:[%s1998_s16 + $0x28] sm:$0xff]  ;;  %v631_v45 = vld [vmem:[%s1998_s16 + $0x120] sm:$0xff] }
  0x48   : > { %691 = vmatpush.msra.mxu1 %v621_v24  ;;  %669 = vmatpush.msra.mxu0 %v604_v26  ;;  %v617_v40 = vld [vmem:[%s1998_s16 + $0xb0] sm:$0xff]  ;;  %v648_v43 = vld [vmem:[%s1998_s16 + $0x1a8] sm:$0xff]  ;;  %v599_v46 = vld [vmem:[%s1998_s16 + $0x20] sm:$0xff] }
  0x49   : > { %738 = vmatpush.msra.mxu3 %v652_v27  ;;  %716 = vmatpush.msra.mxu2 %v635_v29  ;;  %v616_v44 = vld [vmem:[%s1998_s16 + $0xa8] sm:$0xff]  ;;  %v647_v47 = vld [vmem:[%s1998_s16 + $0x1a0] sm:$0xff]  ;;  %v630_v49 = vld [vmem:[%s1998_s16 + $0x118] sm:$0xff] }
  0x4a   : > { %692 = vmatpush.msra.mxu1 %v620_v28  ;;  %670 = vmatpush.msra.mxu0 %v603_v30  ;;  %v615_v48 = vld [vmem:[%s1998_s16 + $0xa0] sm:$0xff]  ;;  %v598_v50 = vld [vmem:[%s1998_s16 + $0x18] sm:$0xff]  ;;  %v629_v53 = vld [vmem:[%s1998_s16 + $0x110] sm:$0xff] }
  0x4b   : > { %739 = vmatpush.msra.mxu3 %v651_v31  ;;  %717 = vmatpush.msra.mxu2 %v634_v33  ;;  %v646_v51 = vld [vmem:[%s1998_s16 + $0x198] sm:$0xff]  ;;  %v597_v54 = vld [vmem:[%s1998_s16 + $0x10] sm:$0xff]  ;;  %v628_v57 = vld [vmem:[%s1998_s16 + $0x108] sm:$0xff] }
  0x4c   : > { %693 = vmatpush.msra.mxu1 %v619_v32  ;;  %671 = vmatpush.msra.mxu0 %v602_v34  ;;  %v614_v52 = vld [vmem:[%s1998_s16 + $0x98] sm:$0xff]  ;;  %v645_v55 = vld [vmem:[%s1998_s16 + $0x190] sm:$0xff]  ;;  %v596_v58 = vld [vmem:[%s1998_s16 + $0x8] sm:$0xff] }
  0x4d   : > { %740 = vmatpush.msra.mxu3 %v650_v35  ;;  %718 = vmatpush.msra.mxu2 %v633_v37  ;;  %v613_v56 = vld [vmem:[%s1998_s16 + $0x90] sm:$0xff]  ;;  %v644_v59 = vld [vmem:[%s1998_s16 + $0x188] sm:$0xff]  ;;  %v627_v61 = vld [vmem:[%s1998_s16 + $0x100] sm:$0xff] }
  0x4e   : > { %694 = vmatpush.msra.mxu1 %v618_v36  ;;  %672 = vmatpush.msra.mxu0 %v601_v38  ;;  %v612_v60 = vld [vmem:[%s1998_s16 + $0x88] sm:$0xff]  ;;  %v595_v62 = vld [vmem:[%s1998_s16] sm:$0xff]  ;;  %v810_v63 = vld [vmem:[%s2007_s22 + $0x178] sm:$0xff] }
  0x4f   : > { %741 = vmatpush.msra.mxu3 %v649_v39  ;;  %719 = vmatpush.msra.mxu2 %v632_v41  ;;  %v643_v0 = vld [vmem:[%s1998_s16 + $0x180] sm:$0xff]  ;;  %v778_v1 = vld [vmem:[%s2007_s22 + $0x78] sm:$0xff]  ;;  %v809_v3 = vld [vmem:[%s2007_s22 + $0x170] sm:$0xff] }
  0x50   : > { %695 = vmatpush.msra.mxu1 %v617_v40  ;;  %673 = vmatpush.msra.mxu0 %v600_v42  ;;  %v826_v2 = vld [vmem:[%s2007_s22 + $0x1f8] sm:$0xff]  ;;  %v611_v4 = vld [vmem:[%s1998_s16 + $0x80] sm:$0xff]  ;;  %v777_v5 = vld [vmem:[%s2007_s22 + $0x70] sm:$0xff] }
  0x51   : > { %742 = vmatpush.msra.mxu3 %v648_v43  ;;  %720 = vmatpush.msra.mxu2 %v631_v45  ;;  %v794_v6 = vld [vmem:[%s2007_s22 + $0xf8] sm:$0xff]  ;;  %v808_v7 = vld [vmem:[%s2007_s22 + $0x168] sm:$0xff]  ;;  %v825_v8 = vld [vmem:[%s2007_s22 + $0x1f0] sm:$0xff] }
  0x52   : > { %696 = vmatpush.msra.mxu1 %v616_v44  ;;  %674 = vmatpush.msra.mxu0 %v599_v46  ;;  %v776_v9 = vld [vmem:[%s2007_s22 + $0x68] sm:$0xff]  ;;  %v793_v10 = vld [vmem:[%s2007_s22 + $0xf0] sm:$0xff]  ;;  %v807_v11 = vld [vmem:[%s2007_s22 + $0x160] sm:$0xff] }
  0x53   : > { %743 = vmatpush.msra.mxu3 %v647_v47  ;;  %721 = vmatpush.msra.mxu2 %v630_v49  ;;  %v824_v12 = vld [vmem:[%s2007_s22 + $0x1e8] sm:$0xff]  ;;  %v775_v13 = vld [vmem:[%s2007_s22 + $0x60] sm:$0xff]  ;;  %v806_v15 = vld [vmem:[%s2007_s22 + $0x158] sm:$0xff] }
  0x54   : > { %697 = vmatpush.msra.mxu1 %v615_v48  ;;  %675 = vmatpush.msra.mxu0 %v598_v50  ;;  %v792_v14 = vld [vmem:[%s2007_s22 + $0xe8] sm:$0xff]  ;;  %v823_v16 = vld [vmem:[%s2007_s22 + $0x1e0] sm:$0xff]  ;;  %v774_v17 = vld [vmem:[%s2007_s22 + $0x58] sm:$0xff] }
  0x55   : > { %744 = vmatpush.msra.mxu3 %v646_v51  ;;  %722 = vmatpush.msra.mxu2 %v629_v53  ;;  %v791_v18 = vld [vmem:[%s2007_s22 + $0xe0] sm:$0xff]  ;;  %v805_v19 = vld [vmem:[%s2007_s22 + $0x150] sm:$0xff]  ;;  %v822_v20 = vld [vmem:[%s2007_s22 + $0x1d8] sm:$0xff] }
  0x56   : > { %698 = vmatpush.msra.mxu1 %v614_v52  ;;  %676 = vmatpush.msra.mxu0 %v597_v54  ;;  %v773_v21 = vld [vmem:[%s2007_s22 + $0x50] sm:$0xff]  ;;  %v790_v22 = vld [vmem:[%s2007_s22 + $0xd8] sm:$0xff]  ;;  %v804_v23 = vld [vmem:[%s2007_s22 + $0x148] sm:$0xff] }
  0x57   : > { %745 = vmatpush.msra.mxu3 %v645_v55  ;;  %723 = vmatpush.msra.mxu2 %v628_v57  ;;  %v821_v24 = vld [vmem:[%s2007_s22 + $0x1d0] sm:$0xff]  ;;  %v772_v25 = vld [vmem:[%s2007_s22 + $0x48] sm:$0xff]  ;;  %v803_v27 = vld [vmem:[%s2007_s22 + $0x140] sm:$0xff] }
  0x58   : > { %699 = vmatpush.msra.mxu1 %v613_v56  ;;  %677 = vmatpush.msra.mxu0 %v596_v58  ;;  %v789_v26 = vld [vmem:[%s2007_s22 + $0xd0] sm:$0xff]  ;;  %v820_v28 = vld [vmem:[%s2007_s22 + $0x1c8] sm:$0xff]  ;;  %v771_v30 = vld [vmem:[%s2007_s22 + $0x40] sm:$0xff] }
  0x59   : > { %746 = vmatpush.msra.mxu3 %v644_v59  ;;  %724 = vmatpush.msra.mxu2 %v627_v61  ;;  %v589_v29 = vld [vmem:[%s1982_s27 + $0x10] sm:$0xff]  ;;  %v788_v31 = vld [vmem:[%s2007_s22 + $0xc8] sm:$0xff]  ;;  %v802_v32 = vld [vmem:[%s2007_s22 + $0x138] sm:$0xff] }
  0x5a   : > { %700 = vmatpush.msra.mxu1 %v612_v60  ;;  %678 = vmatpush.msra.mxu0 %v595_v62  ;;  %v819_v33 = vld [vmem:[%s2007_s22 + $0x1c0] sm:$0xff]  ;;  %v590_v35 = vld [vmem:[%s1982_s27 + $0x18] sm:$0xff]  ;;  %v801_v38 = vld [vmem:[%s2007_s22 + $0x130] sm:$0xff] }
  0x5b   : > { %877 = vmatpush.msrb.mxu2 %v810_v63  ;;  %747 = vmatpush.msra.mxu3 %v643_v0  ;;  %v587_v34 = vld [vmem:[%s1982_s27] sm:$0xff]  ;;  %v770_v36 = vld [vmem:[%s2007_s22 + $0x38] sm:$0xff]  ;;  %v588_v40 = vld [vmem:[%s1982_s27 + $0x8] sm:$0xff] }
  0x5c   : > { %831 = vmatpush.msrb.mxu0 %v778_v1  ;;  %701 = vmatpush.msra.mxu1 %v611_v4  ;;  %v787_v37 = vld [vmem:[%s2007_s22 + $0xc0] sm:$0xff]  ;;  %v818_v39 = vld [vmem:[%s2007_s22 + $0x1b8] sm:$0xff]  ;;  %v769_v41 = vld [vmem:[%s2007_s22 + $0x30] sm:$0xff] }
  0x5d   : > { %900 = vmatpush.msrb.mxu3 %v826_v2  ;;  %878 = vmatpush.msrb.mxu2 %v809_v3  ;;  %v786_v42 = vld [vmem:[%s2007_s22 + $0xb8] sm:$0xff]  ;;  %v800_v43 = vld [vmem:[%s2007_s22 + $0x128] sm:$0xff]  ;;  %v817_v44 = vld [vmem:[%s2007_s22 + $0x1b0] sm:$0xff] }
  0x5e   : > { %832 = vmatpush.msrb.mxu0 %v777_v5  ;;  %854 = vmatpush.msrb.mxu1 %v794_v6  ;;  %v768_v45 = vld [vmem:[%s2007_s22 + $0x28] sm:$0xff]  ;;  %v785_v46 = vld [vmem:[%s2007_s22 + $0xb0] sm:$0xff]  ;;  %v799_v47 = vld [vmem:[%s2007_s22 + $0x120] sm:$0xff] }
  0x5f   : > { %879 = vmatpush.msrb.mxu2 %v808_v7  ;;  %901 = vmatpush.msrb.mxu3 %v825_v8  ;;  %v816_v48 = vld [vmem:[%s2007_s22 + $0x1a8] sm:$0xff]  ;;  %v593_v49 = vld [vmem:[%s1982_s27 + $0x30] sm:$0xff]  ;;  %v767_v50 = vld [vmem:[%s2007_s22 + $0x20] sm:$0xff] }
  0x60   : > { %833 = vmatpush.msrb.mxu0 %v776_v9  ;;  %855 = vmatpush.msrb.mxu1 %v793_v10  ;;  %v784_v51 = vld [vmem:[%s2007_s22 + $0xa8] sm:$0xff]  ;;  %v798_v52 = vld [vmem:[%s2007_s22 + $0x118] sm:$0xff]  ;;  %v815_v53 = vld [vmem:[%s2007_s22 + $0x1a0] sm:$0xff] }
  0x61   : > { %880 = vmatpush.msrb.mxu2 %v807_v11  ;;  %902 = vmatpush.msrb.mxu3 %v824_v12  ;;  %v591_v54 = vld [vmem:[%s1982_s27 + $0x20] sm:$0xff]  ;;  %v594_v55 = vld [vmem:[%s1982_s27 + $0x38] sm:$0xff]  ;;  %v797_v58 = vld [vmem:[%s2007_s22 + $0x110] sm:$0xff] }
  0x62   : > { %834 = vmatpush.msrb.mxu0 %v775_v13  ;;  %856 = vmatpush.msrb.mxu1 %v792_v14  ;;  %v766_v56 = vld [vmem:[%s2007_s22 + $0x18] sm:$0xff]  ;;  %v783_v57 = vld [vmem:[%s2007_s22 + $0xa0] sm:$0xff]  ;;  %v592_v60 = vld [vmem:[%s1982_s27 + $0x28] sm:$0xff] }
  0x63   : > { %881 = vmatpush.msrb.mxu2 %v806_v15  ;;  %903 = vmatpush.msrb.mxu3 %v823_v16  ;;  %v814_v59 = vld [vmem:[%s2007_s22 + $0x198] sm:$0xff]  ;;  %v765_v61 = vld [vmem:[%s2007_s22 + $0x10] sm:$0xff]  ;;  %v796_v63 = vld [vmem:[%s2007_s22 + $0x108] sm:$0xff] }
  0x64   : > { %835 = vmatpush.msrb.mxu0 %v774_v17  ;;  %857 = vmatpush.msrb.mxu1 %v791_v18  ;;  %v782_v62 = vld [vmem:[%s2007_s22 + $0x98] sm:$0xff]  ;;  %v813_v0 = vld [vmem:[%s2007_s22 + $0x190] sm:$0xff]  ;;  %v764_v1 = vld [vmem:[%s2007_s22 + $0x8] sm:$0xff] }
  0x65   : > { %882 = vmatpush.msrb.mxu2 %v805_v19  ;;  %904 = vmatpush.msrb.mxu3 %v822_v20  ;;  %v781_v2 = vld [vmem:[%s2007_s22 + $0x90] sm:$0xff]  ;;  %v795_v3 = vld [vmem:[%s2007_s22 + $0x100] sm:$0xff]  ;;  %v812_v4 = vld [vmem:[%s2007_s22 + $0x188] sm:$0xff] }
  0x66   : > { %836 = vmatpush.msrb.mxu0 %v773_v21  ;;  %858 = vmatpush.msrb.mxu1 %v790_v22  ;;  %v757_v5 = vld [vmem:[%s1987_s15 + $0x10] sm:$0xff]  ;;  %v763_v6 = vld [vmem:[%s2007_s22] sm:$0xff]  ;;  %v780_v7 = vld [vmem:[%s2007_s22 + $0x88] sm:$0xff] }
  0x67   : > { %883 = vmatpush.msrb.mxu2 %v804_v23  ;;  %905 = vmatpush.msrb.mxu3 %v821_v24  ;;  %v811_v8 = vld [vmem:[%s2007_s22 + $0x180] sm:$0xff]  ;;  %v758_v10 = vld [vmem:[%s1987_s15 + $0x18] sm:$0xff]  ;;  %v756_v13 = vld [vmem:[%s1987_s15 + $0x8] sm:$0xff] }
  0x68   : > { %837 = vmatpush.msrb.mxu0 %v772_v25  ;;  %859 = vmatpush.msrb.mxu1 %v789_v26  ;;  %v755_v9 = vld [vmem:[%s1987_s15] sm:$0xff]  ;;  %v978_v12 = vld [vmem:[%s2016_s2 + $0x178] sm:$0xff]  ;;  %v977_v15 = vld [vmem:[%s2016_s2 + $0x170] sm:$0xff] }
  0x69   : > { %884 = vmatpush.msrb.mxu2 %v803_v27  ;;  %906 = vmatpush.msrb.mxu3 %v820_v28  ;;  %v779_v11 = vld [vmem:[%s2007_s22 + $0x80] sm:$0xff]  ;;  %v946_v14 = vld [vmem:[%s2016_s2 + $0x78] sm:$0xff]  ;;  %v945_v17 = vld [vmem:[%s2016_s2 + $0x70] sm:$0xff] }
  0x6a   : > { %725 = vmatmul.f32.vlgmr.msra.gmra.mxu2 %v589_v29  ;;  %838 = vmatpush.msrb.mxu0 %v771_v30  ;;  %v994_v16 = vld [vmem:[%s2016_s2 + $0x1f8] sm:$0xff]  ;;  %v976_v19 = vld [vmem:[%s2016_s2 + $0x168] sm:$0xff]  ;;  %v993_v20 = vld [vmem:[%s2016_s2 + $0x1f0] sm:$0xff] }
  0x6b   : > { %860 = vmatpush.msrb.mxu1 %v788_v31  ;;  %885 = vmatpush.msrb.mxu2 %v802_v32  ;;  %v962_v18 = vld [vmem:[%s2016_s2 + $0xf8] sm:$0xff]  ;;  %v761_v21 = vld [vmem:[%s1987_s15 + $0x30] sm:$0xff]  ;;  %v944_v22 = vld [vmem:[%s2016_s2 + $0x68] sm:$0xff] }
  0x6c   : > { %907 = vmatpush.msrb.mxu3 %v819_v33  ;;  %679 = vmatmul.f32.vlgmr.msra.gmra.mxu0 %v587_v34  ;;  %v961_v23 = vld [vmem:[%s2016_s2 + $0xf0] sm:$0xff]  ;;  %v975_v24 = vld [vmem:[%s2016_s2 + $0x160] sm:$0xff]  ;;  %v762_v26 = vld [vmem:[%s1987_s15 + $0x38] sm:$0xff] }
  0x6d   : > { %748 = vmatmul.f32.vlgmr.msra.gmra.mxu3 %v590_v35  ;;  %839 = vmatpush.msrb.mxu0 %v770_v36  ;;  %v759_v25 = vld [vmem:[%s1987_s15 + $0x20] sm:$0xff]  ;;  %v992_v27 = vld [vmem:[%s2016_s2 + $0x1e8] sm:$0xff]  ;;  %v974_v30 = vld [vmem:[%s2016_s2 + $0x158] sm:$0xff] }
  0x6e   : > { %861 = vmatpush.msrb.mxu1 %v787_v37  ;;  %886 = vmatpush.msrb.mxu2 %v801_v38  ;;  %v943_v28 = vld [vmem:[%s2016_s2 + $0x60] sm:$0xff]  ;;  %v760_v29 = vld [vmem:[%s1987_s15 + $0x28] sm:$0xff]  ;;  %v942_v33 = vld [vmem:[%s2016_s2 + $0x58] sm:$0xff] }
  0x6f   : > { %908 = vmatpush.msrb.mxu3 %v818_v39  ;;  %702 = vmatmul.f32.vlgmr.msra.gmra.mxu1 %v588_v40  ;;  %v960_v31 = vld [vmem:[%s2016_s2 + $0xe8] sm:$0xff]  ;;  %v991_v32 = vld [vmem:[%s2016_s2 + $0x1e0] sm:$0xff]  ;;  %v973_v35 = vld [vmem:[%s2016_s2 + $0x150] sm:$0xff] }
  0x70   : > { %840 = vmatpush.msrb.mxu0 %v769_v41  ;;  %862 = vmatpush.msrb.mxu1 %v786_v42  ;;  %v959_v34 = vld [vmem:[%s2016_s2 + $0xe0] sm:$0xff]  ;;  %v990_v36 = vld [vmem:[%s2016_s2 + $0x1d8] sm:$0xff]  ;;  %v941_v37 = vld [vmem:[%s2016_s2 + $0x50] sm:$0xff] }
  0x71   : > { %887 = vmatpush.msrb.mxu2 %v800_v43  ;;  %909 = vmatpush.msrb.mxu3 %v817_v44  ;;  %v958_v38 = vld [vmem:[%s2016_s2 + $0xd8] sm:$0xff]  ;;  %v972_v39 = vld [vmem:[%s2016_s2 + $0x148] sm:$0xff]  ;;  %v989_v40 = vld [vmem:[%s2016_s2 + $0x1d0] sm:$0xff] }
  0x72   : > { %841 = vmatpush.msrb.mxu0 %v768_v45  ;;  %863 = vmatpush.msrb.mxu1 %v785_v46  ;;  %v940_v41 = vld [vmem:[%s2016_s2 + $0x48] sm:$0xff]  ;;  %v957_v42 = vld [vmem:[%s2016_s2 + $0xd0] sm:$0xff]  ;;  %v971_v43 = vld [vmem:[%s2016_s2 + $0x140] sm:$0xff] }
  0x73   : > { %888 = vmatpush.msrb.mxu2 %v799_v47  ;;  %910 = vmatpush.msrb.mxu3 %v816_v48  ;;  %v988_v44 = vld [vmem:[%s2016_s2 + $0x1c8] sm:$0xff]  ;;  %v939_v45 = vld [vmem:[%s2016_s2 + $0x40] sm:$0xff]  ;;  %v970_v47 = vld [vmem:[%s2016_s2 + $0x138] sm:$0xff] }
  0x74   : > { %728 = vmatmul.f32.gmra.mxu2 %v593_v49  ;;  %842 = vmatpush.msrb.mxu0 %v767_v50  ;;  %v956_v46 = vld [vmem:[%s2016_s2 + $0xc8] sm:$0xff]  ;;  %v987_v48 = vld [vmem:[%s2016_s2 + $0x1c0] sm:$0xff]  ;;  %v938_v49 = vld [vmem:[%s2016_s2 + $0x38] sm:$0xff] }
  0x75   : > { %864 = vmatpush.msrb.mxu1 %v784_v51  ;;  %889 = vmatpush.msrb.mxu2 %v798_v52  ;;  %v955_v50 = vld [vmem:[%s2016_s2 + $0xc0] sm:$0xff]  ;;  %v969_v51 = vld [vmem:[%s2016_s2 + $0x130] sm:$0xff]  ;;  %v986_v52 = vld [vmem:[%s2016_s2 + $0x1b8] sm:$0xff] }
  0x76   : > { %911 = vmatpush.msrb.mxu3 %v815_v53  ;;  %682 = vmatmul.f32.gmra.mxu0 %v591_v54  ;;  %v937_v53 = vld [vmem:[%s2016_s2 + $0x30] sm:$0xff]  ;;  %v954_v54 = vld [vmem:[%s2016_s2 + $0xb8] sm:$0xff] }
  0x77   : > { %751 = vmatmul.f32.gmra.mxu3 %v594_v55  ;;  %843 = vmatpush.msrb.mxu0 %v766_v56  ;;  %v968_v55 = vld [vmem:[%s2016_s2 + $0x128] sm:$0xff]  ;;  %v985_v56 = vld [vmem:[%s2016_s2 + $0x1b0] sm:$0xff] }
  0x78   : > { %865 = vmatpush.msrb.mxu1 %v783_v57  ;;  %890 = vmatpush.msrb.mxu2 %v797_v58  ;;  %v936_v57 = vld [vmem:[%s2016_s2 + $0x28] sm:$0xff]  ;;  %v953_v58 = vld [vmem:[%s2016_s2 + $0xb0] sm:$0xff] }
  0x79   : > { %912 = vmatpush.msrb.mxu3 %v814_v59  ;;  %705 = vmatmul.f32.gmra.mxu1 %v592_v60  ;;  %v967_v59 = vld [vmem:[%s2016_s2 + $0x120] sm:$0xff]  ;;  %v984_v60 = vld [vmem:[%s2016_s2 + $0x1a8] sm:$0xff] }
  0x7a   : > { %844 = vmatpush.msrb.mxu0 %v765_v61  ;;  %866 = vmatpush.msrb.mxu1 %v782_v62  ;;  %v935_v61 = vld [vmem:[%s2016_s2 + $0x20] sm:$0xff]  ;;  %v952_v62 = vld [vmem:[%s2016_s2 + $0xa8] sm:$0xff] }
  0x7b   : > { %891 = vmatpush.msrb.mxu2 %v796_v63  ;;  %913 = vmatpush.msrb.mxu3 %v813_v0  ;;  %v966_v63 = vld [vmem:[%s2016_s2 + $0x118] sm:$0xff]  ;;  %v983_v0 = vld [vmem:[%s2016_s2 + $0x1a0] sm:$0xff] }
  0x7c   : > { %845 = vmatpush.msrb.mxu0 %v764_v1  ;;  %867 = vmatpush.msrb.mxu1 %v781_v2  ;;  %v934_v1 = vld [vmem:[%s2016_s2 + $0x18] sm:$0xff]  ;;  %v951_v2 = vld [vmem:[%s2016_s2 + $0xa0] sm:$0xff] }
  0x7d   : > { %892 = vmatpush.msrb.mxu2 %v795_v3  ;;  %914 = vmatpush.msrb.mxu3 %v812_v4  ;;  %v965_v3 = vld [vmem:[%s2016_s2 + $0x110] sm:$0xff]  ;;  %v982_v4 = vld [vmem:[%s2016_s2 + $0x198] sm:$0xff] }
  0x7e   : > { %893 = vmatmul.f32.vlgmr.msrb.gmra.mxu2 %v757_v5  ;;  %846 = vmatpush.msrb.mxu0 %v763_v6  ;;  %v933_v5 = vld [vmem:[%s2016_s2 + $0x10] sm:$0xff]  ;;  %v950_v6 = vld [vmem:[%s2016_s2 + $0x98] sm:$0xff] }
  0x7f   : > { %868 = vmatpush.msrb.mxu1 %v780_v7  ;;  %915 = vmatpush.msrb.mxu3 %v811_v8  ;;  %v964_v7 = vld [vmem:[%s2016_s2 + $0x108] sm:$0xff]  ;;  %v981_v8 = vld [vmem:[%s2016_s2 + $0x190] sm:$0xff] }
  0x80   : > { %847 = vmatmul.f32.vlgmr.msrb.gmra.mxu0 %v755_v9  ;;  %916 = vmatmul.f32.vlgmr.msrb.gmra.mxu3 %v758_v10  ;;  %v932_v9 = vld [vmem:[%s2016_s2 + $0x8] sm:$0xff]  ;;  %v949_v10 = vld [vmem:[%s2016_s2 + $0x90] sm:$0xff] }
  0x81   : > { %869 = vmatpush.msrb.mxu1 %v779_v11  ;;  %1045 = vmatpush.msra.mxu2 %v978_v12  ;;  %v963_v11 = vld [vmem:[%s2016_s2 + $0x100] sm:$0xff]  ;;  %v980_v12 = vld [vmem:[%s2016_s2 + $0x188] sm:$0xff] }
  0x82   : > { %870 = vmatmul.f32.vlgmr.msrb.gmra.mxu1 %v756_v13  ;;  %999 = vmatpush.msra.mxu0 %v946_v14  ;;  %v925_v13 = vld [vmem:[%s1992_s30 + $0x10] sm:$0xff]  ;;  %v931_v14 = vld [vmem:[%s2016_s2] sm:$0xff] }
  0x83   : > { %1046 = vmatpush.msra.mxu2 %v977_v15  ;;  %1068 = vmatpush.msra.mxu3 %v994_v16  ;;  %v948_v15 = vld [vmem:[%s2016_s2 + $0x88] sm:$0xff]  ;;  %v979_v16 = vld [vmem:[%s2016_s2 + $0x180] sm:$0xff] }
  0x84   : > { %1000 = vmatpush.msra.mxu0 %v945_v17  ;;  %1022 = vmatpush.msra.mxu1 %v962_v18  ;;  %v923_v17 = vld [vmem:[%s1992_s30] sm:$0xff]  ;;  %v926_v18 = vld [vmem:[%s1992_s30 + $0x18] sm:$0xff] }
  0x85   : > { %1047 = vmatpush.msra.mxu2 %v976_v19  ;;  %1069 = vmatpush.msra.mxu3 %v993_v20  ;;  %v947_v19 = vld [vmem:[%s2016_s2 + $0x80] sm:$0xff]  ;;  %v924_v20 = vld [vmem:[%s1992_s30 + $0x8] sm:$0xff] }
  0x86   : > { %896 = vmatmul.f32.gmra.mxu2 %v761_v21  ;;  %1001 = vmatpush.msra.mxu0 %v944_v22  ;;  %v929_v21 = vld [vmem:[%s1992_s30 + $0x30] sm:$0xff]  ;;  %v927_v22 = vld [vmem:[%s1992_s30 + $0x20] sm:$0xff] }
  0x87   : > { %1023 = vmatpush.msra.mxu1 %v961_v23  ;;  %1048 = vmatpush.msra.mxu2 %v975_v24  ;;  %v930_v23 = vld [vmem:[%s1992_s30 + $0x38] sm:$0xff]  ;;  %v928_v24 = vld [vmem:[%s1992_s30 + $0x28] sm:$0xff]  ;;  %s2472_s30 = scalar_lea.vmem %s2429_s4, %s1977_s26 }
  0x88   : > { %850 = vmatmul.f32.gmra.mxu0 %v759_v25  ;;  %919 = vmatmul.f32.gmra.mxu3 %v762_v26 }
  0x89   : > { %1070 = vmatpush.msra.mxu3 %v992_v27  ;;  %1002 = vmatpush.msra.mxu0 %v943_v28 }
  0x8a   : > { %873 = vmatmul.f32.gmra.mxu1 %v760_v29  ;;  %1049 = vmatpush.msra.mxu2 %v974_v30 }
  0x8b   : > { %1024 = vmatpush.msra.mxu1 %v960_v31  ;;  %1071 = vmatpush.msra.mxu3 %v991_v32 }
  0x8c   : > { %1003 = vmatpush.msra.mxu0 %v942_v33  ;;  %1050 = vmatpush.msra.mxu2 %v973_v35  ;;  %v1733_v35 = vld [vmem:[%s560_s19] ss:$0 sm:$0xff] }
  0x8d   : > { %1025 = vmatpush.msra.mxu1 %v959_v34  ;;  %1072 = vmatpush.msra.mxu3 %v990_v36 }
  0x8e   : > { %1004 = vmatpush.msra.mxu0 %v941_v37  ;;  %1051 = vmatpush.msra.mxu2 %v972_v39  ;;  %v1732_v37 = vld [vmem:[%s2472_s30] ss:$0 sm:$0xff] }
  0x8f   : > { %1026 = vmatpush.msra.mxu1 %v958_v38  ;;  %1073 = vmatpush.msra.mxu3 %v989_v40 }
  0x90   : > { %1005 = vmatpush.msra.mxu0 %v940_v41  ;;  %1052 = vmatpush.msra.mxu2 %v971_v43 }
  0x91   : > { %1027 = vmatpush.msra.mxu1 %v957_v42  ;;  %1074 = vmatpush.msra.mxu3 %v988_v44 }
  0x92   : > { %1006 = vmatpush.msra.mxu0 %v939_v45  ;;  %1053 = vmatpush.msra.mxu2 %v970_v47 }
  0x93   : > { %1028 = vmatpush.msra.mxu1 %v956_v46  ;;  %1075 = vmatpush.msra.mxu3 %v987_v48 }
  0x94   : > { %1007 = vmatpush.msra.mxu0 %v938_v49  ;;  %1054 = vmatpush.msra.mxu2 %v969_v51 }
  0x95   : > { %1029 = vmatpush.msra.mxu1 %v955_v50  ;;  %1076 = vmatpush.msra.mxu3 %v986_v52 }
  0x96   : > { %1008 = vmatpush.msra.mxu0 %v937_v53  ;;  %1055 = vmatpush.msra.mxu2 %v968_v55 }
  0x97   : > { %1030 = vmatpush.msra.mxu1 %v954_v54  ;;  %1077 = vmatpush.msra.mxu3 %v985_v56 }
  0x98   : > { %1009 = vmatpush.msra.mxu0 %v936_v57  ;;  %1056 = vmatpush.msra.mxu2 %v967_v59 }
  0x99   : > { %1031 = vmatpush.msra.mxu1 %v953_v58  ;;  %1078 = vmatpush.msra.mxu3 %v984_v60  ;;  %v1734_v60 = vld [vmem:[%s568_s3] ss:$0 sm:$0xff] }
  0x9a   : > { %1010 = vmatpush.msra.mxu0 %v935_v61  ;;  %1057 = vmatpush.msra.mxu2 %v966_v63 }
  0x9b   : > { %1032 = vmatpush.msra.mxu1 %v952_v62  ;;  %1079 = vmatpush.msra.mxu3 %v983_v0 }
  0x9c   : > { %1011 = vmatpush.msra.mxu0 %v934_v1  ;;  %1058 = vmatpush.msra.mxu2 %v965_v3 }
  0x9d   : > { %1033 = vmatpush.msra.mxu1 %v951_v2  ;;  %1080 = vmatpush.msra.mxu3 %v982_v4 }
  0x9e   : > { %1012 = vmatpush.msra.mxu0 %v933_v5  ;;  %1059 = vmatpush.msra.mxu2 %v964_v7 }
  0x9f   : > { %1034 = vmatpush.msra.mxu1 %v950_v6  ;;  %1081 = vmatpush.msra.mxu3 %v981_v8 }
  0xa0   : > { %1013 = vmatpush.msra.mxu0 %v932_v9  ;;  %1060 = vmatpush.msra.mxu2 %v963_v11 }
  0xa1   : > { %1035 = vmatpush.msra.mxu1 %v949_v10  ;;  %1082 = vmatpush.msra.mxu3 %v980_v12 }
  0xa2   : > { %1061 = vmatmul.f32.vlgmr.msra.gmra.mxu2 %v925_v13  ;;  %1014 = vmatpush.msra.mxu0 %v931_v14 }
  0xa3   : > { %1036 = vmatpush.msra.mxu1 %v948_v15  ;;  %1083 = vmatpush.msra.mxu3 %v979_v16 }
  0xa4   : > { %1015 = vmatmul.f32.vlgmr.msra.gmra.mxu0 %v923_v17  ;;  %1084 = vmatmul.f32.vlgmr.msra.gmra.mxu3 %v926_v18 }
  0xa5   : > { %1037 = vmatpush.msra.mxu1 %v947_v19 }
  0xa6   : > { %1038 = vmatmul.f32.vlgmr.msra.gmra.mxu1 %v924_v20 }
  0xaa   : > { %1064 = vmatmul.f32.gmra.mxu2 %v929_v21 }
  0xac   : > { %1018 = vmatmul.f32.gmra.mxu0 %v927_v22  ;;  %1087 = vmatmul.f32.gmra.mxu3 %v930_v23 }
  0xae   : > { %1041 = vmatmul.f32.gmra.mxu1 %v928_v24 }
  0xe9   : > { %v680_v25 = vpop.f32.mrf.mxu0 }
  0xea   : > { %v681_v42 = vadd.f32 %v1732_v37, %v680_v25 }
  0xec   : > { %v703_v26 = vpop.f32.mrf.mxu1 }
  0xed   : > { %v726_v27 = vpop.f32.mrf.mxu2  ;;  %v704_v48 = vadd.f32 %v703_v26, %v681_v42  ;;  %v1232_v42 = vld [vmem:[%s2026_s0 + $0x88] sm:$0xff] }
  0xef   : > { %v727_v52 = vadd.f32 %v726_v27, %v704_v48  ;;  %v2320_v48 = vld [vmem:[%s2026_s0 + $0x78] sm:$0xff] }
  0xf0   : > { %v749_v28 = vpop.f32.mrf.mxu3 }
  0xf1   : > { %v750_v55 = vadd.f32 %v749_v28, %v727_v52  ;;  %v1243_v28 = vld [vmem:[%s2026_s0 + $0xe0] sm:$0xff]  ;;  %v2330_v52 = vld [vmem:[%s2026_s0 + $0x58] sm:$0xff] }
  0xf2   : > { %1261 = vmatpush.msrb.mxu2 %v1243_v28  ;;  %v1207_v28 = vld [vmem:[#allocation2 + $0x30] sm:$0xff] }
  0xf3   : > { %v683_v29 = vpop.f32.mrf.mxu0 }
  0xf4   : > { %v684_v53 = vadd.f32 %v1732_v37, %v683_v29  ;;  %v1244_v29 = vld [vmem:[%s2026_s0 + $0xe8] sm:$0xff] }
  0xf5   : > { %1284 = vmatpush.msrb.mxu3 %v1244_v29  ;;  %v1236_v37 = vld [vmem:[%s2026_s0 + $0xa8] sm:$0xff]  ;;  %v1208_v29 = vld [vmem:[#allocation2] sm:$0xff] }
  0xf6   : > { %v706_v30 = vpop.f32.mrf.mxu1 }
  0xf7   : > { %v729_v31 = vpop.f32.mrf.mxu2  ;;  %v707_v56 = vadd.f32 %v706_v30, %v684_v53  ;;  %v2279_v30 = vld [vmem:[%s2026_s0 + $0xf0] sm:$0xff]  ;;  %v1219_v53 = vld [vmem:[%s2026_s0 + $0x20] sm:$0xff] }
  0xf9   : > { %v730_v57 = vadd.f32 %v729_v31, %v707_v56  ;;  %v2282_v31 = vld [vmem:[%s2026_s0 + $0xf8] sm:$0xff]  ;;  %v1221_v56 = vld [vmem:[%s2026_s0 + $0x30] sm:$0xff] }
  0xfa   : > { %v752_v32 = vpop.f32.mrf.mxu3 }
  0xfb   : > { %v753_v58 = vadd.f32 %v752_v32, %v730_v57  ;;  %v1239_v32 = vld [vmem:[%s2026_s0 + $0xc0] sm:$0xff]  ;;  %v1222_v57 = vld [vmem:[%s2026_s0 + $0x38] sm:$0xff] }
  0xfc   : > { %1262 = vmatpush.msrb.mxu2 %v1239_v32 }
  0xfd   : > { %v848_v33 = vpop.f32.mrf.mxu0 }
  0xfe   : > { %v849_v39 = vadd.f32 %v1733_v35, %v848_v33  ;;  %v1240_v33 = vld [vmem:[%s2026_s0 + $0xc8] sm:$0xff] }
  0xff   : > { %v871_v34 = vpop.f32.mrf.mxu1  ;;  %1285 = vmatpush.msrb.mxu3 %v1240_v33 }
 0x100   : > { %v872_v44 = vadd.f32 %v871_v34, %v849_v39  ;;  %v2289_v34 = vld [vmem:[%s2026_s0 + $0xd0] sm:$0xff]  ;;  %v2300_v39 = vld [vmem:[%s2026_s0 + $0xb8] sm:$0xff] }
 0x101   : > { %v894_v36 = vpop.f32.mrf.mxu2  ;;  %1286 = vmatpush.msrb.mxu3 %v1236_v37 }
 0x102   : > { %v895_v50 = vadd.f32 %v894_v36, %v872_v44  ;;  %v1235_v36 = vld [vmem:[%s2026_s0 + $0xa0] sm:$0xff]  ;;  %v2310_v44 = vld [vmem:[%s2026_s0 + $0x98] sm:$0xff] }
 0x103   : > { %v917_v38 = vpop.f32.mrf.mxu3  ;;  %1263 = vmatpush.msrb.mxu2 %v1235_v36  ;;  %1287 = vmatpush.msrb.mxu3 %v1232_v42 }
 0x104   : > { %v918_v54 = vadd.f32 %v917_v38, %v895_v50  ;;  %v2297_v38 = vld [vmem:[%s2026_s0 + $0xb0] sm:$0xff]  ;;  %v1224_v50 = vld [vmem:[%s2026_s0 + $0x48] sm:$0xff] }
 0x105   : > { %v851_v40 = vpop.f32.mrf.mxu0 }
 0x106   : > { %v852_v41 = vadd.f32 %v1733_v35, %v851_v40  ;;  %v2292_v35 = vld [vmem:[%s2026_s0 + $0xd8] sm:$0xff] }
 0x107   : > { %v874_v43 = vpop.f32.mrf.mxu1 }
 0x108   : > { %v875_v45 = vadd.f32 %v874_v43, %v852_v41  ;;  %v1231_v41 = vld [vmem:[%s2026_s0 + $0x80] sm:$0xff]  ;;  %v2307_v43 = vld [vmem:[%s2026_s0 + $0x90] sm:$0xff] }
 0x109   : > { %v897_v46 = vpop.f32.mrf.mxu2  ;;  %1264 = vmatpush.msrb.mxu2 %v1231_v41  ;;  %v1214_v41 = vld [vmem:[#allocation2 + $0x38] sm:$0xff] }
 0x10a   : > { %v898_v47 = vadd.f32 %v897_v46, %v875_v45  ;;  %v1227_v45 = vld [vmem:[%s2026_s0 + $0x60] sm:$0xff]  ;;  %v1228_v46 = vld [vmem:[%s2026_s0 + $0x68] sm:$0xff] }
 0x10b   : > { %v920_v49 = vpop.f32.mrf.mxu3  ;;  %1265 = vmatpush.msrb.mxu2 %v1227_v45  ;;  %1288 = vmatpush.msrb.mxu3 %v1228_v46 }
 0x10c   : > { %v921_v51 = vadd.f32 %v920_v49, %v898_v47  ;;  %v2317_v47 = vld [vmem:[%s2026_s0 + $0x70] sm:$0xff]  ;;  %v1223_v49 = vld [vmem:[%s2026_s0 + $0x40] sm:$0xff] }
 0x10d   : > { %1266 = vmatpush.msrb.mxu2 %v1223_v49  ;;  %1289 = vmatpush.msrb.mxu3 %v1224_v50 }
 0x10e   : > { %1612 = vmatpush.xpose.msk.msrb.mxu0 %vm1091_vm0, %v921_v51  ;;  %v2327_v51 = vld [vmem:[%s2026_s0 + $0x50] sm:$0xff] }
 0x10f   : > { %1267 = vmatpush.msrb.mxu2 %v1219_v53 }
 0x112   : > { %1613 = vmatpush.xpose.msk.msrb.mxu0 %vm1091_vm0, %v918_v54  ;;  %v1220_v54 = vld [vmem:[%s2026_s0 + $0x28] sm:$0xff] }
 0x113   : > { %1290 = vmatpush.msrb.mxu3 %v1220_v54 }
 0x115   : > { %1614 = vmatmul.msk.f32.vlgmr.msrb.gmra.mxu0 %vm1091_vm0, %v750_v55 }
 0x116   : > { %1307 = vmatpush.msra.mxu0 %v2279_v30 }
 0x118   : > { %1308 = vmatpush.msra.mxu0 %v2289_v34 }
 0x11a   : > { %1309 = vmatpush.msra.mxu0 %v2297_v38 }
 0x11c   : > { %1310 = vmatpush.msra.mxu0 %v2307_v43 }
 0x11d   : > { %1615 = vmatmul.msk.f32.gmra.mxu0 %vm1091_vm0, %v753_v58 }
 0x11e   : > { %1311 = vmatpush.msra.mxu0 %v2317_v47 }
 0x120   : > { %1312 = vmatpush.msra.mxu0 %v2327_v51 }
 0x121   : > { %v1016_v59 = vpop.f32.mrf.mxu0 }
 0x122   : > { %v1017_v62 = vadd.f32 %v1734_v60, %v1016_v59  ;;  %1313 = vmatpush.msra.mxu0 %v1221_v56 }
 0x123   : > { %v1039_v61 = vpop.f32.mrf.mxu1 }
 0x124   : > { %v1040_v1 = vadd.f32 %v1039_v61, %v1017_v62 }
 0x125   : > { %v1062_v63 = vpop.f32.mrf.mxu2 }
 0x126   : > { %v1063_v5 = vadd.f32 %v1062_v63, %v1040_v1 }
 0x127   : > { %v1085_v0 = vpop.f32.mrf.mxu3 }
 0x128   : > { %v1086_v10 = vadd.f32 %v1085_v0, %v1063_v5 }
 0x129   : > { %v1019_v2 = vpop.f32.mrf.mxu0 }
 0x12a   : > { %v1020_v3 = vadd.f32 %v1734_v60, %v1019_v2 }
 0x12b   : > { %v1042_v4 = vpop.f32.mrf.mxu1 }
 0x12c   : > { %v1043_v6 = vadd.f32 %v1042_v4, %v1020_v3 }
 0x12d   : > { %v1065_v7 = vpop.f32.mrf.mxu2 }
 0x12e   : > { %v1066_v8 = vadd.f32 %v1065_v7, %v1043_v6 }
 0x12f   : > { %v1088_v9 = vpop.f32.mrf.mxu3 }
 0x130   : > { %v1089_v11 = vadd.f32 %v1088_v9, %v1066_v8 }
 0x132   : > { %1198 = vmatpush.msrb.mxu1 %v1089_v11 }
 0x134   : > { %1199 = vmatpush.msrb.mxu1 %v1086_v10 }
 0x136   : > { %1330 = vmatpush.msra.mxu1 %v2282_v31 }
 0x138   : > { %1331 = vmatpush.msra.mxu1 %v2292_v35 }
 0x13a   : > { %1332 = vmatpush.msra.mxu1 %v2300_v39 }
 0x13c   : > { %1333 = vmatpush.msra.mxu1 %v2310_v44 }
 0x13e   : > { %1334 = vmatpush.msra.mxu1 %v2320_v48 }
 0x140   : > { %1335 = vmatpush.msra.mxu1 %v2330_v52 }
 0x142   : > { %1336 = vmatpush.msra.mxu1 %v1222_v57 }
 0x192   : > { %v1121_v12 = vpop.f32.mrf.mxu0 }
 0x193   : > { %v1127_v13 = vmul.f32 0.044194173, %v1121_v12 }
 0x195   : > { %v1130_v14 = vsel %vm1129_vm1, %v1127_v13, -inf }
 0x196   : > { %1131 = vmax.xlane.f32.xlu0 %v1130_v14 }
 0x19a   : > { %v1124_v15 = vpop.f32.mrf.mxu0 }
 0x19b   : > { %v1128_v16 = vmul.f32 0.044194173, %v1124_v15 }
 0x19d   : > { %v1133_v17 = vsel %vm1129_vm1, %v1128_v16, -inf }
 0x19e   : > { %1134 = vmax.xlane.f32.xlu0 %v1133_v17  ;;  %v1216_v17 = vld [vmem:[%s2026_s0 + $0x8] sm:$0xff] }
 0x19f   : > { %1291 = vmatpush.msrb.mxu3 %v1216_v17 }
 0x1a1   : > { %1650 = vmatpush.msra.mxu3 %v2282_v31 }
 0x1a3   : > { %1651 = vmatpush.msra.mxu3 %v2292_v35  ;;  %v1212_v35 = vld [vmem:[#allocation2 + $0x20] sm:$0xff] }
 0x1a5   : > { %1652 = vmatpush.msra.mxu3 %v2300_v39 }
 0x1a7   : > { %1653 = vmatpush.msra.mxu3 %v2310_v44 }
 0x1a9   : > { %1654 = vmatpush.msra.mxu3 %v2320_v48 }
 0x1ab   : > { %1655 = vmatpush.msra.mxu3 %v2330_v52 }
 0x1ad   : > { %1656 = vmatpush.msra.mxu3 %v1222_v57 }
 0x209   : > { %v1132_v18 = vpop.xlane.xlu0 %1131 }
 0x20a   : > { %v1136_v19 = vsub.f32 %v1127_v13, %v1132_v18  ;;  %v1217_v18 = vld [vmem:[%s2026_s0 + $0x10] sm:$0xff] }
 0x20b   : > { %1314 = vmatpush.msra.mxu0 %v1217_v18 }
 0x20c   : > { %v1138_v20 = vmul.f32 1.442695, %v1136_v19  ;;  %v1218_v19 = vld [vmem:[%s2026_s0 + $0x18] sm:$0xff] }
 0x20d   : > { %1337 = vmatpush.msra.mxu1 %v1218_v19  ;;  %1657 = vmatpush.msra.mxu3 %v1218_v19 }
 0x20e   : > { %1735 = vpow2.f32 %v1138_v20 }
 0x211   : > { %v1135_v21 = vpop.xlane.xlu0 %1134 }
 0x212   : > { %v1137_v22 = vsub.f32 %v1128_v16, %v1135_v21  ;;  %v1215_v16 = vld [vmem:[%s2026_s0] sm:$0xff] }
 0x213   : > { %1268 = vmatpush.msrb.mxu2 %v1215_v16 }
 0x214   : > { %v2268_v23 = vpop.eup %1735  ;;  %v1140_v24 = vmul.f32 1.442695, %v1137_v22  ;;  %v1209_v22 = vld [vmem:[#allocation2 + $0x18] sm:$0xff] }
 0x215   : > { %v1142_v25 = vsel %vm1129_vm1, %v2268_v23, 0.0  ;;  %1642 = vmatpush.msra.mxu2 %v2279_v30 }
 0x216   : > { %1737 = vpow2.f32 %v1140_v24  ;;  %1143 = vadd.xlane.f32.xlu1 %v1142_v25 }
 0x217   : > { %1643 = vmatpush.msra.mxu2 %v2289_v34  ;;  %v1211_v34 = vld [vmem:[#allocation2 + $0x8] sm:$0xff] }
 0x219   : > { %1644 = vmatpush.msra.mxu2 %v2297_v38 }
 0x21b   : > { %1645 = vmatpush.msra.mxu2 %v2307_v43 }
 0x21c   : > { %v2272_v26 = vpop.eup %1737 }
 0x21d   : > { %v1145_v27 = vsel %vm1129_vm1, %v2272_v26, 0.0  ;;  %1646 = vmatpush.msra.mxu2 %v2317_v47 }
 0x21e   : > { %1146 = vadd.xlane.f32.xlu1 %v1145_v27 }
 0x21f   : > { %1647 = vmatpush.msra.mxu2 %v2327_v51 }
 0x221   : > { %1648 = vmatpush.msra.mxu2 %v1221_v56 }
 0x223   : > { %1649 = vmatpush.msra.mxu2 %v1217_v18 }
 0x289   : > { %v1144_v40 = vpop.xlane.xlu1 %1143 }
 0x28a   : > { %1739 = vrcp.f32 %v1144_v40  ;;  %v1159_v61 = vand.u32 2147483648, %v1144_v40  ;;  %v1157_v63 = vand.u32 2147483647, %v1144_v40  ;;  %vm1153_vm3 = vweird.f32 %v1144_v40 }
 0x28c   : > { %v1160_v2 = vor.u32 1.1754944e-38, %v1159_v61  ;;  %vm1158_vm5 = vcmp.eq.f32.partialorder %v1157_v63, 8.507059e+37 }
 0x290   : > { %v1740_v55 = vpop.eup %1739 }
 0x291   : > { %v1149_v58 = vmul.f32 %v1740_v55, %v1144_v40  ;;  %v1147_v59 = vpop.xlane.xlu1 %1146  ;;  %vm1154_vm2 = vweird.f32 %v1740_v55  ;;  %v1213_v40 = vld [vmem:[#allocation2 + $0x28] sm:$0xff] }
 0x292   : > { %1741 = vrcp.f32 %v1147_v59  ;;  %vm1155_vm4 = vmor %vm1153_vm3, %vm1154_vm2  ;;  %v1174_v8 = vand.u32 2147483648, %v1147_v59  ;;  %v1172_v10 = vand.u32 2147483647, %v1147_v59  ;;  %vm1168_vm7 = vweird.f32 %v1147_v59 }
 0x293   : > { %v1150_v60 = vsub.f32 1.0, %v1149_v58 }
 0x294   : > { %v1175_v12 = vor.u32 1.1754944e-38, %v1174_v8  ;;  %vm1173_vm9 = vcmp.eq.f32.partialorder %v1172_v10, 8.507059e+37 }
 0x295   : > { %v1151_v62 = vmul.f32 %v1740_v55, %v1150_v60 }
 0x297   : > { %v1152_v0 = vadd.f32 %v1740_v55, %v1151_v62 }
 0x298   : > { %v1742_v1 = vpop.eup %1741 }
 0x299   : > { %v1156_v3 = vsel %vm1155_vm4, %v1740_v55, %v1152_v0  ;;  %v1164_v4 = vmul.f32 %v1742_v1, %v1147_v59  ;;  %vm1169_vm6 = vweird.f32 %v1742_v1 }
 0x29a   : > { %v1161_v5 = vsel %vm1158_vm5, %v1160_v2, %v1156_v3  ;;  %vm1170_vm8 = vmor %vm1168_vm7, %vm1169_vm6 }
 0x29b   : > { %v1165_v6 = vsub.f32 1.0, %v1164_v4  ;;  %v1162_v7 = vmul.f32 %v2268_v23, %v1161_v5  ;;  %v1210_v23 = vld [vmem:[#allocation2 + $0x10] sm:$0xff] }
 0x29d   : > { %v1166_v9 = vmul.f32 %v1742_v1, %v1165_v6  ;;  %1616 = vmatmul.msk.f32.vlgmr.msrb.gmra.mxu1 %vm1129_vm1, %v1162_v7 }
 0x29f   : > { %v1167_v11 = vadd.f32 %v1742_v1, %v1166_v9 }
 0x2a1   : > { %v1171_v13 = vsel %vm1170_vm8, %v1742_v1, %v1167_v11 }
 0x2a2   : > { %v1176_v14 = vsel %vm1173_vm9, %v1175_v12, %v1171_v13 }
 0x2a3   : > { %v1177_v15 = vmul.f32 %v2272_v26, %v1176_v14 }
 0x2a5   : > { %1617 = vmatmul.msk.f32.gmra.mxu1 %vm1129_vm1, %v1177_v15 }
 0x31a   : > { %v1201_v20 = vpop.f32.mrf.mxu1 }
 0x31b   : > { %1618 = vmatmul.msk.f32.vlgmr.msrb.gmra.mxu2 %vm1091_vm0, %v1201_v20  ;;  %1620 = vmatmul.msk.f32.vlgmr.msrb.gmra.mxu3 %vm1091_vm0, %v1201_v20 }
 0x31c   : > { %1622 = vmatmul.msk.f32.vlgmr.msra.gmra.mxu0 %vm1091_vm0, %v1201_v20  ;;  %1624 = vmatmul.msk.f32.vlgmr.msra.gmra.mxu1 %vm1091_vm0, %v1201_v20 }
 0x322   : > { %v1204_v21 = vpop.f32.mrf.mxu1 }
 0x323   : > { %1619 = vmatmul.msk.f32.gmra.mxu2 %vm1091_vm0, %v1204_v21  ;;  %1621 = vmatmul.msk.f32.gmra.mxu3 %vm1091_vm0, %v1204_v21 }
 0x32b   : > { %1623 = vmatmul.msk.f32.vlgmr.msra.gmra.mxu2 %vm1091_vm0, %v1204_v21  ;;  %1625 = vmatmul.msk.f32.vlgmr.msra.gmra.mxu3 %vm1091_vm0, %v1204_v21 }
 0x399   : > { %v1316_v24 = vpop.f32.mrf.mxu0  ;;  %v1339_v25 = vpop.f32.mrf.mxu1 }
 0x39a   : > { %v1347_v26 = vadd.f32 %v1316_v24, %v1209_v22  ;;  %v1348_v27 = vadd.f32 %v1339_v25, %v1210_v23 }
 0x39c   : > { %1355 = vst [vmem:[#allocation2 + $0x18] sm:$0xff] %v1347_v26 }
 0x39d   : > { %1356 = vst [vmem:[#allocation2 + $0x10] sm:$0xff] %v1348_v27 }
 0x39e   : > { %v1270_v30 = vpop.f32.mrf.mxu2  ;;  %v1293_v31 = vpop.f32.mrf.mxu3 }
 0x39f   : > { %v1345_v32 = vadd.f32 %v1270_v30, %v1207_v28  ;;  %v1346_v33 = vadd.f32 %v1293_v31, %v1208_v29 }
 0x3a1   : > { %1353 = vst [vmem:[#allocation2 + $0x30] sm:$0xff] %v1345_v32 }
 0x3a2   : > { %1354 = vst [vmem:[#allocation2] sm:$0xff] %v1346_v33 }
 0x3a6   : > { %v1273_v36 = vpop.f32.mrf.mxu2  ;;  %v1296_v37 = vpop.f32.mrf.mxu3 }
 0x3a7   : > { %v1349_v38 = vadd.f32 %v1273_v36, %v1211_v34  ;;  %v1350_v39 = vadd.f32 %v1296_v37, %v1212_v35 }
 0x3a9   : > { %1357 = vst [vmem:[#allocation2 + $0x8] sm:$0xff] %v1349_v38 }
 0x3aa   : > { %1358 = vst [vmem:[#allocation2 + $0x20] sm:$0xff] %v1350_v39 }
 0x3ae   : > { %v1319_v42 = vpop.f32.mrf.mxu2  ;;  %v1342_v43 = vpop.f32.mrf.mxu3  ;;  %1364 = sbr.rel (%p1626_p1) target bundleno = 960 (0x3c0), region = 72 }
 0x3af   : > { %v1351_v44 = vadd.f32 %v1319_v42, %v1213_v40  ;;  %v1352_v45 = vadd.f32 %v1342_v43, %v1214_v41 }
 0x3b1   : > { %1359 = vst [vmem:[#allocation2 + $0x28] sm:$0xff] %v1351_v44 }
 0x3b2   : > { %1360 = vst [vmem:[#allocation2 + $0x38] sm:$0xff] %v1352_v45 }
 0x3b3   : > { %v1365_v46 = vld [vmem:[#allocation2 + $0x30] sm:$0xff]  ;;  %v1373_v47 = vld [vmem:[%s2435_s10] sm:$0xf]  ;;  %v1367_v51 = vld [vmem:[#allocation2 + $0x18] sm:$0xff] }
 0x3b4   : > { %v1366_v48 = vld [vmem:[#allocation2] sm:$0xff]  ;;  %v1375_v49 = vperm.slane %v1373_v47, 0  ;;  %v1376_v50 = vperm.slane %v1373_v47, 1  ;;  %v1377_v52 = vperm.slane %v1373_v47, 2  ;;  %v1368_v53 = vld [vmem:[#allocation2 + $0x10] sm:$0xff]  ;;  %v1378_v54 = vperm.slane %v1373_v47, 3 }
 0x3b5   : > { %v1369_v55 = vld [vmem:[#allocation2 + $0x8] sm:$0xff]  ;;  %v1370_v59 = vld [vmem:[#allocation2 + $0x20] sm:$0xff] }
 0x3b6   : > { %v1383_v56 = vadd.f32 %v1375_v49, %v1365_v46  ;;  %v1384_v57 = vadd.f32 %v1376_v50, %v1366_v48  ;;  %v1385_v58 = vadd.f32 %v1377_v52, %v1367_v51  ;;  %v1386_v60 = vadd.f32 %v1378_v54, %v1368_v53 }
 0x3b7   : > { %v1387_v62 = vadd.f32 %v1375_v49, %v1369_v55  ;;  %v1388_v0 = vadd.f32 %v1376_v50, %v1370_v59 }
 0x3b8   : > { %v1371_v61 = vld [vmem:[#allocation2 + $0x28] sm:$0xff]  ;;  %1391 = vst [vmem:[%s2028_s18] sm:$0xff] %v1383_v56 }
 0x3b9   : > { %v1372_v63 = vld [vmem:[#allocation2 + $0x38] sm:$0xff]  ;;  %1392 = vst [vmem:[%s2028_s18 + $0x8] sm:$0xff] %v1384_v57  ;;  %v1389_v1 = vadd.f32 %v1377_v52, %v1371_v61 }
 0x3ba   : > { %1393 = vst [vmem:[%s2028_s18 + $0x10] sm:$0xff] %v1385_v58  ;;  %v1390_v2 = vadd.f32 %v1378_v54, %v1372_v63 }
 0x3bb   : > { %1394 = vst [vmem:[%s2028_s18 + $0x18] sm:$0xff] %v1386_v60 }
 0x3bc   : > { %1395 = vst [vmem:[%s2028_s18 + $0x20] sm:$0xff] %v1387_v62 }
 0x3bd   : > { %1396 = vst [vmem:[%s2028_s18 + $0x28] sm:$0xff] %v1388_v0 }
 0x3be   : > { %1397 = vst [vmem:[%s2028_s18 + $0x30] sm:$0xff] %v1389_v1 }
 0x3bf   : > { %1398 = vst [vmem:[%s2028_s18 + $0x38] sm:$0xff] %v1390_v2 }
 0x3c0 PF: > { %s2473_s20 = sld [smem:[#allocation7_spill]]  ;;  %s1641_s13 = sshll.u32 %s1825_s21, 6 }
 0x3c1   : > { %s2475_s19 = sld [smem:[#allocation21_spill]]  ;;  %s1413_s11 = sshll.u32 %s2028_s18, 4  ;;  %s1414_s11 = int_to_ptr.vmem [resolvable:$true] %s1413_s11 }
 0x3c6   : > { %s2477_s29 = sand.u32 1, %s2473_s20  }
 0x3c7   : > { %s2476_s14 = smov %s2475_s19  ;;  %s1412_s12 = scalar_lea.hbm %s2475_s19, %s1641_s13 }
 0x3c8   : > { %s1415_s24 = sshll.u32 %s1412_s12, 4  ;;  %s1400_s28 = scalar_lea.sflag [#allocation4], %s2477_s29  ;;  %s1416_s24 = int_to_ptr.hbm [resolvable:$true] %s1415_s24 }
 0x3c9   : > { %s1757_s0 = sshra.s32 %s1416_s24, 4  ;;  %s1763_s21 = scalar_lea.hbm %s2476_s14, 128  ;;  %s1758_s0 = int_to_ptr.hbm [resolvable:$true] %s1757_s0 }
 0x3ca   : > { %s1759_s1 = scalar_lea.hbm %s1758_s0, 64  ;;  %p1764_p6 = scmp.lt.s32.totalorder %s1758_s0, %s2476_s14 }
 0x3cb   : > { %p1760_p2 = scmp.ne.s32.totalorder %s1758_s0, %s1759_s1  ;;  %p1765_p7 = scmp.lt.s32.totalorder %s1763_s21, %s1759_s1 }
 0x3cd   : > { %p1761_p4 = pnand %p1760_p2, %p1951_p3  ;;  %p1766_p8 = por %p1765_p7, %p1764_p6 }
 0x3cf   : > { %p1762_p5 = pneg %p1761_p4 }
 0x3d1   : > { %p1767_p10 = pnand %p1766_p8, %p1762_p5 }
 0x3d3   : > { %1770 = shalt.err (!%p1767_p10)
}
 0x3d4   : > { %s1840_s18 = smov 512   ;;  %s1841_s15 = smov 32  }
 0x3d5   : > { %1658 = dma.vmem_to_hbm [thread:$0]  (%p1951_p3), %s1414_s11, 1024, %s1416_s24, %s1400_s28, %s1840_s18, %s1840_s18, %s1841_s15  }
 0x3d6 PF: > { %s2478_s25 = sld [smem:[#allocation11_spill]] }
 0x3d7   : > { %s2479_s3 = sld [smem:[#allocation6_spill]] }
 0x3dc   : > { %p1664_p11 = scmp.ge.s32.totalorder %s2478_s25, 2 }
 0x3dd   : > { %s1430_s20 = sand.u32 1, %s2479_s3  }
 0x3de   : > { %p1661_p12 = pnand %p1664_p11, %p1961_p9  ;;  %s1431_s13 = scalar_lea.sflag [#allocation4], %s1430_s20 }
 0x3e0   : > { %p1662_p13 = pneg %p1661_p12 }
 0x3e2   : > { %1804 = dma.done.wait (%p1662_p13), %s1431_s13, 1024  }
 0x3e3   : > { %1806 = vsyncadd (%p1662_p13), %s1431_s13, 4294966272  ;;  %s24_s24 = sadd.s32 1, %s2478_s25   ;;  %s2481_s17 = sld [smem:[#allocation7_spill]] }
 0x3e4   : > { %p21_p0 = scmp.ge.s32.totalorder %s24_s24, 18   ;;  %s2482_s18 = sld [smem:[#allocation8_spill]] }
 0x3e5   : > { %s2483_s19 = sld [smem:[#allocation16_spill]] }
 0x3e6   : > { %s2484_s20 = sld [smem:[#allocation9_spill]]  ;;  %23 = sbr.rel (!%p21_p0) target bundleno = 11 (0xb), region = 134 }
 0x3e7   : > { %s2485_s21 = sld [smem:[#allocation10_spill]] }
 0x3e8   : > { %s2486_s22 = sld [smem:[#allocation12_spill]] }
 0x3e9   : > { %s2487_s23 = sld [smem:[#allocation14_spill]] }
 0x3eb   :  { %1437 = vsyncpa [#allocation4], 1 }
 0x3ec   :  { %1439 = vsyncpa [#allocation4 + $0x1], 1 }

</bundles_post_ra>
